<compile_context>
chip_gen: v7x
topology: tpu7x:2x2x1
jax: 0.10.0
libtpu: 0.0.40
codegen_flags: <defaults>
</compile_context>

<pallas_src>
import functools

import jax
import jax.numpy as jnp
from jax.experimental import pallas as pl
from jax.experimental.pallas import tpu as pltpu


# ----------------------------------------------------------------------------
# Kernel 1: MLP (fc74 -> tanh -> fc75 -> tanh -> fc76 -> 340+1160*sigmoid) and
#           mean over the K samples, gridded over row strips of the (S, S) map.
#
# Grid: (S // TM,).  w76 is laid out as (S, 64, S) so the streamed block
# (TM, 64, S) is a contiguous HBM slab; Pallas auto double-buffers it.
# ----------------------------------------------------------------------------
def _mlp_mean_kernel(x_ref, w74_ref, b74_ref, w75_ref, b75_ref,
                     w76_ref, b76_ref, o_ref, *, tile_rows):
    # c5 = tanh(fc75(tanh(fc74(x))))  -- (K, 64).  Recomputed per tile: the
    # cost is negligible (K rows, 64-wide) and it keeps this grid axis truly
    # parallel (safe for megacore sharding on v7x).
    h = jnp.tanh(jnp.dot(x_ref[...], w74_ref[...],
                         preferred_element_type=jnp.float32) + b74_ref[...])
    c5 = jnp.tanh(jnp.dot(h, w75_ref[...],
                          preferred_element_type=jnp.float32) + b75_ref[...])

    # fc76 for this strip of TM output rows: per row, (K, S) logits ->
    # SteepSigmoid(beta=1) affine -> mean over the K samples (== the running
    # average in the PyTorch loop).
    for r in range(tile_rows):                                   # static, unrolled
        z = jnp.dot(c5, w76_ref[r],
                    preferred_element_type=jnp.float32) + b76_ref[r:r + 1, :]
        y = 340.0 + 1160.0 / (1.0 + jnp.exp(-z))                  # (K, S)
        o_ref[r:r + 1, :] = jnp.mean(y, axis=0, keepdims=True)    # (1, S)


# ----------------------------------------------------------------------------
# Kernel 2: fixed 5x5 circular convolution with the avg_op21 weights, done
#           padding-free via the separable decomposition
#               avg_op21 = (1/64)*box5x5 + (1/64)*box3x3 + (15/32)*delta
#           (box kernels are symmetric, so roll direction is irrelevant).
#           Rolls go to the XLU; only ~13 adds + 3 muls per element on the VPU.
# ----------------------------------------------------------------------------
def _avg_conv_kernel(x_ref, b_ref, o_ref):
    x = x_ref[...]                                               # (S, S) f32
    S0, S1 = x.shape
    rr = lambda a, s: pltpu.roll(a, shift=s, axis=0)             # row (sublane)
    rc = lambda a, s: pltpu.roll(a, shift=s, axis=1)             # col (lane)

    r3 = rr(x, 1) + x + rr(x, S0 - 1)                            # 3-tap row sum
    r5 = r3 + rr(x, 2) + rr(x, S0 - 2)                           # 5-tap row sum
    box3 = rc(r3, 1) + r3 + rc(r3, S1 - 1)
    box5 = rc(r5, 2) + rc(r5, 1) + r5 + rc(r5, S1 - 1) + rc(r5, S1 - 2)

    o_ref[...] = ((box5 + box3) * (1.0 / 64.0)
                  + x * (15.0 / 32.0)
                  + b_ref[0, 0])


# ----------------------------------------------------------------------------
# Tile-size picker: largest row-strip TM (multiple of 8, dividing S) whose w76
# tile (TM*64*S*4 bytes) stays <= ~2 MiB, with at least 4 grid steps.
# ----------------------------------------------------------------------------
def _pick_tile_rows(S, target_bytes=2 * 1024 * 1024):
    best = 8
    for tm in range(8, S // 4 + 1, 8):
        if S % tm == 0 and tm * 64 * S * 4 <= target_bytes:
            best = tm
    return best


# ----------------------------------------------------------------------------
# Wrapper (glue in plain JAX: gathers + final NCHW reshape)
# ----------------------------------------------------------------------------
def prenet_forward(params, output, bsize, ntb, n, tile_rows=None):
    S = 64 * n
    L = 4 * n
    K = bsize * ntb
    din = 3 * L * L
    TM = tile_rows if tile_rows is not None else _pick_tile_rows(S)
    assert S % TM == 0

    # get_local_Loss: local_res[:,:,x,y] = output[:,:,15*(x+1),15*(y+1)]
    idx = 15 * (jnp.arange(L) + 1)
    local = output[:, :, idx[:, None], idx[None, :]]             # (B, 1, L, L)
    local_flat = local.reshape(output.shape[0], L * L)

    # X[k] = flatten(t_ref_sol[k : k+3])  -- single gather, no per-k slices.
    rows = jnp.arange(K)[:, None] + jnp.arange(3)[None, :]       # (K, 3)
    X = local_flat[rows].reshape(K, din).astype(jnp.float32)

    ref_2 = pl.pallas_call(
        functools.partial(_mlp_mean_kernel, tile_rows=TM),
        out_shape=jax.ShapeDtypeStruct((S, S), jnp.float32),
        grid_spec=pltpu.PrefetchScalarGridSpec(
            num_scalar_prefetch=0,
            grid=(S // TM,),
            in_specs=[
                pl.BlockSpec((K, din), lambda j: (0, 0)),        # resident
                pl.BlockSpec((din, 64), lambda j: (0, 0)),       # resident
                pl.BlockSpec((1, 64), lambda j: (0, 0)),         # resident
                pl.BlockSpec((64, 64), lambda j: (0, 0)),        # resident
                pl.BlockSpec((1, 64), lambda j: (0, 0)),         # resident
                pl.BlockSpec((TM, 64, S), lambda j: (j, 0, 0)),  # streamed w76
                pl.BlockSpec((TM, S), lambda j: (j, 0)),         # streamed b76
            ],
            out_specs=pl.BlockSpec((TM, S), lambda j: (j, 0)),
        ),
        compiler_params=pltpu.CompilerParams(
            dimension_semantics=("parallel",)),                  # v7x: 2 TCs
    )(X, params["w74"], params["b74"], params["w75"], params["b75"],
      params["w76"], params["b76"])

    # F.interpolate to the identical size (bilinear, align_corners=False) is
    # the identity map -> no-op.

    # Fixed circular 5x5 conv, whole plane in one block (rolls handle the wrap).
    # TODO(synk): for very large S (>= ~2048) grid this over row strips with a
    #             2-row circular halo to bound VMEM and shard across TCs.
    ref_speed = pl.pallas_call(
        _avg_conv_kernel,
        out_shape=jax.ShapeDtypeStruct((S, S), jnp.float32),
        in_specs=[pl.BlockSpec(memory_space=pltpu.MemorySpace.VMEM),
                  pl.BlockSpec(memory_space=pltpu.MemorySpace.SMEM)],
        out_specs=pl.BlockSpec(memory_space=pltpu.MemorySpace.VMEM),
    )(ref_2, params["conv_b"])

    # ref_speed[:, :, :, :] = ref_2  -> final tensor is the conv output, NCHW.
    return ref_speed.reshape(1, 1, S, S)


# ----------------------------------------------------------------------------
# Deterministic parameter init (mirrors nn.Linear / nn.Conv2d default bounds)
# ----------------------------------------------------------------------------
def init_params(key, n):
    S = 64 * n
    L = 4 * n
    d_in = 3 * L * L
    ks = jax.random.split(key, 4)

    def linear(k, fan_in, fan_out):
        kw, kb = jax.random.split(k)
        bound = 1.0 / (fan_in ** 0.5)
        # stored pre-transposed: (in, out) so the kernel does x @ W
        w = jax.random.uniform(kw, (fan_in, fan_out), jnp.float32, -bound, bound)
        b = jax.random.uniform(kb, (1, fan_out), jnp.float32, -bound, bound)
        return w, b

    w74, b74 = linear(ks[0], d_in, 64)
    w75, b75 = linear(ks[1], 64, 64)
    w76_flat, b76_flat = linear(ks[2], 64, S * S)     # (64, S*S), (1, S*S)

    # Reshape once at init so each streamed fc76 tile is a contiguous HBM slab
    # and the kernel writes the (S, S) map directly:
    #   w76[r, h, c] == w76_flat[h, r*S + c],   b76[r, c] == b76_flat[0, r*S + c]
    w76 = jnp.transpose(w76_flat.reshape(64, S, S), (1, 0, 2))   # (S, 64, S)
    b76 = b76_flat.reshape(S, S)

    # avg_op21 is fixed and folded into the conv kernel as constants.
    # Conv2d default bias init: U(-1/sqrt(fan_in), 1/sqrt(fan_in)), fan_in=25.
    conv_b = jax.random.uniform(ks[3], (1, 1), jnp.float32, -0.2, 0.2)

    return dict(w74=w74, b74=b74, w75=w75, b75=b75, w76=w76, b76=b76,
                conv_b=conv_b)


if __name__ == "__main__":
    n = 1              # self.num
    bsize = 2
    ntb = 2
    B = bsize * ntb + 2            # forward indexes t_ref_sol[k : k+3]
    H = W = 64                     # must be >= 15 * 4n + 1 = 61

    key = jax.random.PRNGKey(0)
    k_par, k_in = jax.random.split(key)
    params = init_params(k_par, n)
    output = jax.random.normal(k_in, (B, 1, H, W), dtype=jnp.float32)

    ref_speed = prenet_forward(params, output, bsize, ntb, n)
    jax.block_until_ready(ref_speed)
    assert ref_speed.shape == (1, 1, 64 * n, 64 * n)
    print("KERNEL_OK")
</pallas_src>

<mosaic_0001>
module attributes {stable_mosaic.version = 11 : i64} {
  func.func @_mlp_mean_kernel(%arg0: i32, %arg1: memref<4x48xf32, #tpu.memory_space<vmem>>, %arg2: memref<48x64xf32, #tpu.memory_space<vmem>>, %arg3: memref<1x64xf32, #tpu.memory_space<vmem>>, %arg4: memref<64x64xf32, #tpu.memory_space<vmem>>, %arg5: memref<1x64xf32, #tpu.memory_space<vmem>>, %arg6: memref<16x64x64xf32, #tpu.memory_space<vmem>>, %arg7: memref<16x64xf32, #tpu.memory_space<vmem>>, %arg8: memref<16x64xf32, #tpu.memory_space<vmem>>) attributes {dimension_semantics = [#tpu.dimension_semantics<parallel>], iteration_bounds = array<i64: 4>, scalar_prefetch = 0 : i64, scratch_operands = 0 : i64, tpu.core_type = #tpu.core_type<tc>, window_params = [{pipeline_mode = #tpu.pipeline_mode<synchronous>, transform_indices = @transform_0, window_bounds = array<i64: 4, 48>}, {pipeline_mode = #tpu.pipeline_mode<synchronous>, transform_indices = @transform_1, window_bounds = array<i64: 48, 64>}, {pipeline_mode = #tpu.pipeline_mode<synchronous>, transform_indices = @transform_2, window_bounds = array<i64: 1, 64>}, {pipeline_mode = #tpu.pipeline_mode<synchronous>, transform_indices = @transform_3, window_bounds = array<i64: 64, 64>}, {pipeline_mode = #tpu.pipeline_mode<synchronous>, transform_indices = @transform_4, window_bounds = array<i64: 1, 64>}, {transform_indices = @transform_5, window_bounds = array<i64: 16, 64, 64>}, {transform_indices = @transform_6, window_bounds = array<i64: 16, 64>}, {transform_indices = @transform_7, window_bounds = array<i64: 16, 64>}]} {
    %c0 = arith.constant 0 : index
    %c0_0 = arith.constant 0 : index
    %0 = vector.load %arg1[%c0, %c0_0] : memref<4x48xf32, #tpu.memory_space<vmem>>, vector<4x48xf32>
    %c0_1 = arith.constant 0 : index
    %c0_2 = arith.constant 0 : index
    %1 = vector.load %arg2[%c0_1, %c0_2] : memref<48x64xf32, #tpu.memory_space<vmem>>, vector<48x64xf32>
    %cst = arith.constant dense<0.000000e+00> : vector<4x64xf32>
    %2 = tpu.matmul %0, %1, %cst {dimension_numbers = #tpu.dot_dimension_numbers<[1], [0], [0], [1], [0, 0, 1, 1], [], []>} : vector<4x48xf32>, vector<48x64xf32>, vector<4x64xf32> -> vector<4x64xf32>
    %c0_3 = arith.constant 0 : index
    %c0_4 = arith.constant 0 : index
    %3 = vector.load %arg3[%c0_3, %c0_4] : memref<1x64xf32, #tpu.memory_space<vmem>>, vector<1x64xf32>
    %4 = vector.broadcast %3 : vector<1x64xf32> to vector<4x64xf32>
    %5 = arith.addf %2, %4 : vector<4x64xf32>
    %6 = math.tanh %5 : vector<4x64xf32>
    %c0_5 = arith.constant 0 : index
    %c0_6 = arith.constant 0 : index
    %7 = vector.load %arg4[%c0_5, %c0_6] : memref<64x64xf32, #tpu.memory_space<vmem>>, vector<64x64xf32>
    %cst_7 = arith.constant dense<0.000000e+00> : vector<4x64xf32>
    %8 = tpu.matmul %6, %7, %cst_7 {dimension_numbers = #tpu.dot_dimension_numbers<[1], [0], [0], [1], [0, 0, 1, 1], [], []>} : vector<4x64xf32>, vector<64x64xf32>, vector<4x64xf32> -> vector<4x64xf32>
    %c0_8 = arith.constant 0 : index
    %c0_9 = arith.constant 0 : index
    %9 = vector.load %arg5[%c0_8, %c0_9] : memref<1x64xf32, #tpu.memory_space<vmem>>, vector<1x64xf32>
    %10 = vector.broadcast %9 : vector<1x64xf32> to vector<4x64xf32>
    %11 = arith.addf %8, %10 : vector<4x64xf32>
    %12 = math.tanh %11 : vector<4x64xf32>
    %c0_10 = arith.constant 0 : index
    %c0_11 = arith.constant 0 : index
    %c0_12 = arith.constant 0 : index
    %13 = vector.load %arg6[%c0_10, %c0_11, %c0_12] : memref<16x64x64xf32, #tpu.memory_space<vmem>>, vector<1x64x64xf32>
    %14 = vector.shape_cast %13 : vector<1x64x64xf32> to vector<64x64xf32>
    %cst_13 = arith.constant dense<0.000000e+00> : vector<4x64xf32>
    %15 = tpu.matmul %12, %14, %cst_13 {dimension_numbers = #tpu.dot_dimension_numbers<[1], [0], [0], [1], [0, 0, 1, 1], [], []>} : vector<4x64xf32>, vector<64x64xf32>, vector<4x64xf32> -> vector<4x64xf32>
    %c0_14 = arith.constant 0 : index
    %c0_15 = arith.constant 0 : index
    %16 = vector.load %arg7[%c0_14, %c0_15] : memref<16x64xf32, #tpu.memory_space<vmem>>, vector<1x64xf32>
    %17 = vector.broadcast %16 : vector<1x64xf32> to vector<4x64xf32>
    %18 = arith.addf %15, %17 : vector<4x64xf32>
    %cst_16 = arith.constant 0.000000e+00 : f32
    %19 = vector.broadcast %cst_16 : f32 to vector<4x64xf32>
    %20 = arith.subf %19, %18 : vector<4x64xf32>
    %21 = math.exp %20 : vector<4x64xf32>
    %cst_17 = arith.constant 1.000000e+00 : f32
    %22 = vector.broadcast %cst_17 : f32 to vector<4x64xf32>
    %23 = arith.addf %22, %21 : vector<4x64xf32>
    %cst_18 = arith.constant 1.160000e+03 : f32
    %24 = vector.broadcast %cst_18 : f32 to vector<4x64xf32>
    %25 = arith.divf %24, %23 : vector<4x64xf32>
    %cst_19 = arith.constant 3.400000e+02 : f32
    %26 = vector.broadcast %cst_19 : f32 to vector<4x64xf32>
    %27 = arith.addf %26, %25 : vector<4x64xf32>
    %cst_20 = arith.constant dense<0.000000e+00> : vector<64xf32>
    %28 = vector.multi_reduction <add>, %27, %cst_20 [0] : vector<4x64xf32> to vector<64xf32>
    %29 = vector.shape_cast %28 : vector<64xf32> to vector<1x64xf32>
    %cst_21 = arith.constant 4.000000e+00 : f32
    %30 = vector.broadcast %cst_21 : f32 to vector<1x64xf32>
    %31 = arith.divf %29, %30 : vector<1x64xf32>
    %c0_22 = arith.constant 0 : index
    %c0_23 = arith.constant 0 : index
    %32 = vector.load %arg8[%c0_22, %c0_23] : memref<16x64xf32, #tpu.memory_space<vmem>>, vector<1x64xf32>
    tpu.vector_store %arg8[%c0_22, %c0_23], %31 {strides = array<i32>} : memref<16x64xf32, #tpu.memory_space<vmem>>, vector<1x64xf32>,
    %c1 = arith.constant 1 : index
    %c0_24 = arith.constant 0 : index
    %c0_25 = arith.constant 0 : index
    %33 = vector.load %arg6[%c1, %c0_24, %c0_25] : memref<16x64x64xf32, #tpu.memory_space<vmem>>, vector<1x64x64xf32>
    %34 = vector.shape_cast %33 : vector<1x64x64xf32> to vector<64x64xf32>
    %cst_26 = arith.constant dense<0.000000e+00> : vector<4x64xf32>
    %35 = tpu.matmul %12, %34, %cst_26 {dimension_numbers = #tpu.dot_dimension_numbers<[1], [0], [0], [1], [0, 0, 1, 1], [], []>} : vector<4x64xf32>, vector<64x64xf32>, vector<4x64xf32> -> vector<4x64xf32>
    %c1_27 = arith.constant 1 : index
    %c0_28 = arith.constant 0 : index
    %36 = vector.load %arg7[%c1_27, %c0_28] : memref<16x64xf32, #tpu.memory_space<vmem>>, vector<1x64xf32>
    %37 = vector.broadcast %36 : vector<1x64xf32> to vector<4x64xf32>
    %38 = arith.addf %35, %37 : vector<4x64xf32>
    %cst_29 = arith.constant 0.000000e+00 : f32
    %39 = vector.broadcast %cst_29 : f32 to vector<4x64xf32>
    %40 = arith.subf %39, %38 : vector<4x64xf32>
    %41 = math.exp %40 : vector<4x64xf32>
    %cst_30 = arith.constant 1.000000e+00 : f32
    %42 = vector.broadcast %cst_30 : f32 to vector<4x64xf32>
    %43 = arith.addf %42, %41 : vector<4x64xf32>
    %cst_31 = arith.constant 1.160000e+03 : f32
    %44 = vector.broadcast %cst_31 : f32 to vector<4x64xf32>
    %45 = arith.divf %44, %43 : vector<4x64xf32>
    %cst_32 = arith.constant 3.400000e+02 : f32
    %46 = vector.broadcast %cst_32 : f32 to vector<4x64xf32>
    %47 = arith.addf %46, %45 : vector<4x64xf32>
    %cst_33 = arith.constant dense<0.000000e+00> : vector<64xf32>
    %48 = vector.multi_reduction <add>, %47, %cst_33 [0] : vector<4x64xf32> to vector<64xf32>
    %49 = vector.shape_cast %48 : vector<64xf32> to vector<1x64xf32>
    %cst_34 = arith.constant 4.000000e+00 : f32
    %50 = vector.broadcast %cst_34 : f32 to vector<1x64xf32>
    %51 = arith.divf %49, %50 : vector<1x64xf32>
    %c1_35 = arith.constant 1 : index
    %c0_36 = arith.constant 0 : index
    %52 = vector.load %arg8[%c1_35, %c0_36] : memref<16x64xf32, #tpu.memory_space<vmem>>, vector<1x64xf32>
    tpu.vector_store %arg8[%c1_35, %c0_36], %51 {strides = array<i32>} : memref<16x64xf32, #tpu.memory_space<vmem>>, vector<1x64xf32>,
    %c2 = arith.constant 2 : index
    %c0_37 = arith.constant 0 : index
    %c0_38 = arith.constant 0 : index
    %53 = vector.load %arg6[%c2, %c0_37, %c0_38] : memref<16x64x64xf32, #tpu.memory_space<vmem>>, vector<1x64x64xf32>
    %54 = vector.shape_cast %53 : vector<1x64x64xf32> to vector<64x64xf32>
    %cst_39 = arith.constant dense<0.000000e+00> : vector<4x64xf32>
    %55 = tpu.matmul %12, %54, %cst_39 {dimension_numbers = #tpu.dot_dimension_numbers<[1], [0], [0], [1], [0, 0, 1, 1], [], []>} : vector<4x64xf32>, vector<64x64xf32>, vector<4x64xf32> -> vector<4x64xf32>
    %c2_40 = arith.constant 2 : index
    %c0_41 = arith.constant 0 : index
    %56 = vector.load %arg7[%c2_40, %c0_41] : memref<16x64xf32, #tpu.memory_space<vmem>>, vector<1x64xf32>
    %57 = vector.broadcast %56 : vector<1x64xf32> to vector<4x64xf32>
    %58 = arith.addf %55, %57 : vector<4x64xf32>
    %cst_42 = arith.constant 0.000000e+00 : f32
    %59 = vector.broadcast %cst_42 : f32 to vector<4x64xf32>
    %60 = arith.subf %59, %58 : vector<4x64xf32>
    %61 = math.exp %60 : vector<4x64xf32>
    %cst_43 = arith.constant 1.000000e+00 : f32
    %62 = vector.broadcast %cst_43 : f32 to vector<4x64xf32>
    %63 = arith.addf %62, %61 : vector<4x64xf32>
    %cst_44 = arith.constant 1.160000e+03 : f32
    %64 = vector.broadcast %cst_44 : f32 to vector<4x64xf32>
    %65 = arith.divf %64, %63 : vector<4x64xf32>
    %cst_45 = arith.constant 3.400000e+02 : f32
    %66 = vector.broadcast %cst_45 : f32 to vector<4x64xf32>
    %67 = arith.addf %66, %65 : vector<4x64xf32>
    %cst_46 = arith.constant dense<0.000000e+00> : vector<64xf32>
    %68 = vector.multi_reduction <add>, %67, %cst_46 [0] : vector<4x64xf32> to vector<64xf32>
    %69 = vector.shape_cast %68 : vector<64xf32> to vector<1x64xf32>
    %cst_47 = arith.constant 4.000000e+00 : f32
    %70 = vector.broadcast %cst_47 : f32 to vector<1x64xf32>
    %71 = arith.divf %69, %70 : vector<1x64xf32>
    %c2_48 = arith.constant 2 : index
    %c0_49 = arith.constant 0 : index
    %72 = vector.load %arg8[%c2_48, %c0_49] : memref<16x64xf32, #tpu.memory_space<vmem>>, vector<1x64xf32>
    tpu.vector_store %arg8[%c2_48, %c0_49], %71 {strides = array<i32>} : memref<16x64xf32, #tpu.memory_space<vmem>>, vector<1x64xf32>,
    %c3 = arith.constant 3 : index
    %c0_50 = arith.constant 0 : index
    %c0_51 = arith.constant 0 : index
    %73 = vector.load %arg6[%c3, %c0_50, %c0_51] : memref<16x64x64xf32, #tpu.memory_space<vmem>>, vector<1x64x64xf32>
    %74 = vector.shape_cast %73 : vector<1x64x64xf32> to vector<64x64xf32>
    %cst_52 = arith.constant dense<0.000000e+00> : vector<4x64xf32>
    %75 = tpu.matmul %12, %74, %cst_52 {dimension_numbers = #tpu.dot_dimension_numbers<[1], [0], [0], [1], [0, 0, 1, 1], [], []>} : vector<4x64xf32>, vector<64x64xf32>, vector<4x64xf32> -> vector<4x64xf32>
    %c3_53 = arith.constant 3 : index
    %c0_54 = arith.constant 0 : index
    %76 = vector.load %arg7[%c3_53, %c0_54] : memref<16x64xf32, #tpu.memory_space<vmem>>, vector<1x64xf32>
    %77 = vector.broadcast %76 : vector<1x64xf32> to vector<4x64xf32>
    %78 = arith.addf %75, %77 : vector<4x64xf32>
    %cst_55 = arith.constant 0.000000e+00 : f32
    %79 = vector.broadcast %cst_55 : f32 to vector<4x64xf32>
    %80 = arith.subf %79, %78 : vector<4x64xf32>
    %81 = math.exp %80 : vector<4x64xf32>
    %cst_56 = arith.constant 1.000000e+00 : f32
    %82 = vector.broadcast %cst_56 : f32 to vector<4x64xf32>
    %83 = arith.addf %82, %81 : vector<4x64xf32>
    %cst_57 = arith.constant 1.160000e+03 : f32
    %84 = vector.broadcast %cst_57 : f32 to vector<4x64xf32>
    %85 = arith.divf %84, %83 : vector<4x64xf32>
    %cst_58 = arith.constant 3.400000e+02 : f32
    %86 = vector.broadcast %cst_58 : f32 to vector<4x64xf32>
    %87 = arith.addf %86, %85 : vector<4x64xf32>
    %cst_59 = arith.constant dense<0.000000e+00> : vector<64xf32>
    %88 = vector.multi_reduction <add>, %87, %cst_59 [0] : vector<4x64xf32> to vector<64xf32>
    %89 = vector.shape_cast %88 : vector<64xf32> to vector<1x64xf32>
    %cst_60 = arith.constant 4.000000e+00 : f32
    %90 = vector.broadcast %cst_60 : f32 to vector<1x64xf32>
    %91 = arith.divf %89, %90 : vector<1x64xf32>
    %c3_61 = arith.constant 3 : index
    %c0_62 = arith.constant 0 : index
    %92 = vector.load %arg8[%c3_61, %c0_62] : memref<16x64xf32, #tpu.memory_space<vmem>>, vector<1x64xf32>
    tpu.vector_store %arg8[%c3_61, %c0_62], %91 {strides = array<i32>} : memref<16x64xf32, #tpu.memory_space<vmem>>, vector<1x64xf32>,
    %c4 = arith.constant 4 : index
    %c0_63 = arith.constant 0 : index
    %c0_64 = arith.constant 0 : index
    %93 = vector.load %arg6[%c4, %c0_63, %c0_64] : memref<16x64x64xf32, #tpu.memory_space<vmem>>, vector<1x64x64xf32>
    %94 = vector.shape_cast %93 : vector<1x64x64xf32> to vector<64x64xf32>
    %cst_65 = arith.constant dense<0.000000e+00> : vector<4x64xf32>
    %95 = tpu.matmul %12, %94, %cst_65 {dimension_numbers = #tpu.dot_dimension_numbers<[1], [0], [0], [1], [0, 0, 1, 1], [], []>} : vector<4x64xf32>, vector<64x64xf32>, vector<4x64xf32> -> vector<4x64xf32>
    %c4_66 = arith.constant 4 : index
    %c0_67 = arith.constant 0 : index
    %96 = vector.load %arg7[%c4_66, %c0_67] : memref<16x64xf32, #tpu.memory_space<vmem>>, vector<1x64xf32>
    %97 = vector.broadcast %96 : vector<1x64xf32> to vector<4x64xf32>
    %98 = arith.addf %95, %97 : vector<4x64xf32>
    %cst_68 = arith.constant 0.000000e+00 : f32
    %99 = vector.broadcast %cst_68 : f32 to vector<4x64xf32>
    %100 = arith.subf %99, %98 : vector<4x64xf32>
    %101 = math.exp %100 : vector<4x64xf32>
    %cst_69 = arith.constant 1.000000e+00 : f32
    %102 = vector.broadcast %cst_69 : f32 to vector<4x64xf32>
    %103 = arith.addf %102, %101 : vector<4x64xf32>
    %cst_70 = arith.constant 1.160000e+03 : f32
    %104 = vector.broadcast %cst_70 : f32 to vector<4x64xf32>
    %105 = arith.divf %104, %103 : vector<4x64xf32>
    %cst_71 = arith.constant 3.400000e+02 : f32
    %106 = vector.broadcast %cst_71 : f32 to vector<4x64xf32>
    %107 = arith.addf %106, %105 : vector<4x64xf32>
    %cst_72 = arith.constant dense<0.000000e+00> : vector<64xf32>
    %108 = vector.multi_reduction <add>, %107, %cst_72 [0] : vector<4x64xf32> to vector<64xf32>
    %109 = vector.shape_cast %108 : vector<64xf32> to vector<1x64xf32>
    %cst_73 = arith.constant 4.000000e+00 : f32
    %110 = vector.broadcast %cst_73 : f32 to vector<1x64xf32>
    %111 = arith.divf %109, %110 : vector<1x64xf32>
    %c4_74 = arith.constant 4 : index
    %c0_75 = arith.constant 0 : index
    %112 = vector.load %arg8[%c4_74, %c0_75] : memref<16x64xf32, #tpu.memory_space<vmem>>, vector<1x64xf32>
    tpu.vector_store %arg8[%c4_74, %c0_75], %111 {strides = array<i32>} : memref<16x64xf32, #tpu.memory_space<vmem>>, vector<1x64xf32>,
    %c5 = arith.constant 5 : index
    %c0_76 = arith.constant 0 : index
    %c0_77 = arith.constant 0 : index
    %113 = vector.load %arg6[%c5, %c0_76, %c0_77] : memref<16x64x64xf32, #tpu.memory_space<vmem>>, vector<1x64x64xf32>
    %114 = vector.shape_cast %113 : vector<1x64x64xf32> to vector<64x64xf32>
    %cst_78 = arith.constant dense<0.000000e+00> : vector<4x64xf32>
    %115 = tpu.matmul %12, %114, %cst_78 {dimension_numbers = #tpu.dot_dimension_numbers<[1], [0], [0], [1], [0, 0, 1, 1], [], []>} : vector<4x64xf32>, vector<64x64xf32>, vector<4x64xf32> -> vector<4x64xf32>
    %c5_79 = arith.constant 5 : index
    %c0_80 = arith.constant 0 : index
    %116 = vector.load %arg7[%c5_79, %c0_80] : memref<16x64xf32, #tpu.memory_space<vmem>>, vector<1x64xf32>
    %117 = vector.broadcast %116 : vector<1x64xf32> to vector<4x64xf32>
    %118 = arith.addf %115, %117 : vector<4x64xf32>
    %cst_81 = arith.constant 0.000000e+00 : f32
    %119 = vector.broadcast %cst_81 : f32 to vector<4x64xf32>
    %120 = arith.subf %119, %118 : vector<4x64xf32>
    %121 = math.exp %120 : vector<4x64xf32>
    %cst_82 = arith.constant 1.000000e+00 : f32
    %122 = vector.broadcast %cst_82 : f32 to vector<4x64xf32>
    %123 = arith.addf %122, %121 : vector<4x64xf32>
    %cst_83 = arith.constant 1.160000e+03 : f32
    %124 = vector.broadcast %cst_83 : f32 to vector<4x64xf32>
    %125 = arith.divf %124, %123 : vector<4x64xf32>
    %cst_84 = arith.constant 3.400000e+02 : f32
    %126 = vector.broadcast %cst_84 : f32 to vector<4x64xf32>
    %127 = arith.addf %126, %125 : vector<4x64xf32>
    %cst_85 = arith.constant dense<0.000000e+00> : vector<64xf32>
    %128 = vector.multi_reduction <add>, %127, %cst_85 [0] : vector<4x64xf32> to vector<64xf32>
    %129 = vector.shape_cast %128 : vector<64xf32> to vector<1x64xf32>
    %cst_86 = arith.constant 4.000000e+00 : f32
    %130 = vector.broadcast %cst_86 : f32 to vector<1x64xf32>
    %131 = arith.divf %129, %130 : vector<1x64xf32>
    %c5_87 = arith.constant 5 : index
    %c0_88 = arith.constant 0 : index
    %132 = vector.load %arg8[%c5_87, %c0_88] : memref<16x64xf32, #tpu.memory_space<vmem>>, vector<1x64xf32>
    tpu.vector_store %arg8[%c5_87, %c0_88], %131 {strides = array<i32>} : memref<16x64xf32, #tpu.memory_space<vmem>>, vector<1x64xf32>,
    %c6 = arith.constant 6 : index
    %c0_89 = arith.constant 0 : index
    %c0_90 = arith.constant 0 : index
    %133 = vector.load %arg6[%c6, %c0_89, %c0_90] : memref<16x64x64xf32, #tpu.memory_space<vmem>>, vector<1x64x64xf32>
    %134 = vector.shape_cast %133 : vector<1x64x64xf32> to vector<64x64xf32>
    %cst_91 = arith.constant dense<0.000000e+00> : vector<4x64xf32>
    %135 = tpu.matmul %12, %134, %cst_91 {dimension_numbers = #tpu.dot_dimension_numbers<[1], [0], [0], [1], [0, 0, 1, 1], [], []>} : vector<4x64xf32>, vector<64x64xf32>, vector<4x64xf32> -> vector<4x64xf32>
    %c6_92 = arith.constant 6 : index
    %c0_93 = arith.constant 0 : index
    %136 = vector.load %arg7[%c6_92, %c0_93] : memref<16x64xf32, #tpu.memory_space<vmem>>, vector<1x64xf32>
    %137 = vector.broadcast %136 : vector<1x64xf32> to vector<4x64xf32>
    %138 = arith.addf %135, %137 : vector<4x64xf32>
    %cst_94 = arith.constant 0.000000e+00 : f32
    %139 = vector.broadcast %cst_94 : f32 to vector<4x64xf32>
    %140 = arith.subf %139, %138 : vector<4x64xf32>
    %141 = math.exp %140 : vector<4x64xf32>
    %cst_95 = arith.constant 1.000000e+00 : f32
    %142 = vector.broadcast %cst_95 : f32 to vector<4x64xf32>
    %143 = arith.addf %142, %141 : vector<4x64xf32>
    %cst_96 = arith.constant 1.160000e+03 : f32
    %144 = vector.broadcast %cst_96 : f32 to vector<4x64xf32>
    %145 = arith.divf %144, %143 : vector<4x64xf32>
    %cst_97 = arith.constant 3.400000e+02 : f32
    %146 = vector.broadcast %cst_97 : f32 to vector<4x64xf32>
    %147 = arith.addf %146, %145 : vector<4x64xf32>
    %cst_98 = arith.constant dense<0.000000e+00> : vector<64xf32>
    %148 = vector.multi_reduction <add>, %147, %cst_98 [0] : vector<4x64xf32> to vector<64xf32>
    %149 = vector.shape_cast %148 : vector<64xf32> to vector<1x64xf32>
    %cst_99 = arith.constant 4.000000e+00 : f32
    %150 = vector.broadcast %cst_99 : f32 to vector<1x64xf32>
    %151 = arith.divf %149, %150 : vector<1x64xf32>
    %c6_100 = arith.constant 6 : index
    %c0_101 = arith.constant 0 : index
    %152 = vector.load %arg8[%c6_100, %c0_101] : memref<16x64xf32, #tpu.memory_space<vmem>>, vector<1x64xf32>
    tpu.vector_store %arg8[%c6_100, %c0_101], %151 {strides = array<i32>} : memref<16x64xf32, #tpu.memory_space<vmem>>, vector<1x64xf32>,
    %c7 = arith.constant 7 : index
    %c0_102 = arith.constant 0 : index
    %c0_103 = arith.constant 0 : index
    %153 = vector.load %arg6[%c7, %c0_102, %c0_103] : memref<16x64x64xf32, #tpu.memory_space<vmem>>, vector<1x64x64xf32>
    %154 = vector.shape_cast %153 : vector<1x64x64xf32> to vector<64x64xf32>
    %cst_104 = arith.constant dense<0.000000e+00> : vector<4x64xf32>
    %155 = tpu.matmul %12, %154, %cst_104 {dimension_numbers = #tpu.dot_dimension_numbers<[1], [0], [0], [1], [0, 0, 1, 1], [], []>} : vector<4x64xf32>, vector<64x64xf32>, vector<4x64xf32> -> vector<4x64xf32>
    %c7_105 = arith.constant 7 : index
    %c0_106 = arith.constant 0 : index
    %156 = vector.load %arg7[%c7_105, %c0_106] : memref<16x64xf32, #tpu.memory_space<vmem>>, vector<1x64xf32>
    %157 = vector.broadcast %156 : vector<1x64xf32> to vector<4x64xf32>
    %158 = arith.addf %155, %157 : vector<4x64xf32>
    %cst_107 = arith.constant 0.000000e+00 : f32
    %159 = vector.broadcast %cst_107 : f32 to vector<4x64xf32>
    %160 = arith.subf %159, %158 : vector<4x64xf32>
    %161 = math.exp %160 : vector<4x64xf32>
    %cst_108 = arith.constant 1.000000e+00 : f32
    %162 = vector.broadcast %cst_108 : f32 to vector<4x64xf32>
    %163 = arith.addf %162, %161 : vector<4x64xf32>
    %cst_109 = arith.constant 1.160000e+03 : f32
    %164 = vector.broadcast %cst_109 : f32 to vector<4x64xf32>
    %165 = arith.divf %164, %163 : vector<4x64xf32>
    %cst_110 = arith.constant 3.400000e+02 : f32
    %166 = vector.broadcast %cst_110 : f32 to vector<4x64xf32>
    %167 = arith.addf %166, %165 : vector<4x64xf32>
    %cst_111 = arith.constant dense<0.000000e+00> : vector<64xf32>
    %168 = vector.multi_reduction <add>, %167, %cst_111 [0] : vector<4x64xf32> to vector<64xf32>
    %169 = vector.shape_cast %168 : vector<64xf32> to vector<1x64xf32>
    %cst_112 = arith.constant 4.000000e+00 : f32
    %170 = vector.broadcast %cst_112 : f32 to vector<1x64xf32>
    %171 = arith.divf %169, %170 : vector<1x64xf32>
    %c7_113 = arith.constant 7 : index
    %c0_114 = arith.constant 0 : index
    %172 = vector.load %arg8[%c7_113, %c0_114] : memref<16x64xf32, #tpu.memory_space<vmem>>, vector<1x64xf32>
    tpu.vector_store %arg8[%c7_113, %c0_114], %171 {strides = array<i32>} : memref<16x64xf32, #tpu.memory_space<vmem>>, vector<1x64xf32>,
    %c8 = arith.constant 8 : index
    %c0_115 = arith.constant 0 : index
    %c0_116 = arith.constant 0 : index
    %173 = vector.load %arg6[%c8, %c0_115, %c0_116] : memref<16x64x64xf32, #tpu.memory_space<vmem>>, vector<1x64x64xf32>
    %174 = vector.shape_cast %173 : vector<1x64x64xf32> to vector<64x64xf32>
    %cst_117 = arith.constant dense<0.000000e+00> : vector<4x64xf32>
    %175 = tpu.matmul %12, %174, %cst_117 {dimension_numbers = #tpu.dot_dimension_numbers<[1], [0], [0], [1], [0, 0, 1, 1], [], []>} : vector<4x64xf32>, vector<64x64xf32>, vector<4x64xf32> -> vector<4x64xf32>
    %c8_118 = arith.constant 8 : index
    %c0_119 = arith.constant 0 : index
    %176 = vector.load %arg7[%c8_118, %c0_119] : memref<16x64xf32, #tpu.memory_space<vmem>>, vector<1x64xf32>
    %177 = vector.broadcast %176 : vector<1x64xf32> to vector<4x64xf32>
    %178 = arith.addf %175, %177 : vector<4x64xf32>
    %cst_120 = arith.constant 0.000000e+00 : f32
    %179 = vector.broadcast %cst_120 : f32 to vector<4x64xf32>
    %180 = arith.subf %179, %178 : vector<4x64xf32>
    %181 = math.exp %180 : vector<4x64xf32>
    %cst_121 = arith.constant 1.000000e+00 : f32
    %182 = vector.broadcast %cst_121 : f32 to vector<4x64xf32>
    %183 = arith.addf %182, %181 : vector<4x64xf32>
    %cst_122 = arith.constant 1.160000e+03 : f32
    %184 = vector.broadcast %cst_122 : f32 to vector<4x64xf32>
    %185 = arith.divf %184, %183 : vector<4x64xf32>
    %cst_123 = arith.constant 3.400000e+02 : f32
    %186 = vector.broadcast %cst_123 : f32 to vector<4x64xf32>
    %187 = arith.addf %186, %185 : vector<4x64xf32>
    %cst_124 = arith.constant dense<0.000000e+00> : vector<64xf32>
    %188 = vector.multi_reduction <add>, %187, %cst_124 [0] : vector<4x64xf32> to vector<64xf32>
    %189 = vector.shape_cast %188 : vector<64xf32> to vector<1x64xf32>
    %cst_125 = arith.constant 4.000000e+00 : f32
    %190 = vector.broadcast %cst_125 : f32 to vector<1x64xf32>
    %191 = arith.divf %189, %190 : vector<1x64xf32>
    %c8_126 = arith.constant 8 : index
    %c0_127 = arith.constant 0 : index
    %192 = vector.load %arg8[%c8_126, %c0_127] : memref<16x64xf32, #tpu.memory_space<vmem>>, vector<1x64xf32>
    tpu.vector_store %arg8[%c8_126, %c0_127], %191 {strides = array<i32>} : memref<16x64xf32, #tpu.memory_space<vmem>>, vector<1x64xf32>,
    %c9 = arith.constant 9 : index
    %c0_128 = arith.constant 0 : index
    %c0_129 = arith.constant 0 : index
    %193 = vector.load %arg6[%c9, %c0_128, %c0_129] : memref<16x64x64xf32, #tpu.memory_space<vmem>>, vector<1x64x64xf32>
    %194 = vector.shape_cast %193 : vector<1x64x64xf32> to vector<64x64xf32>
    %cst_130 = arith.constant dense<0.000000e+00> : vector<4x64xf32>
    %195 = tpu.matmul %12, %194, %cst_130 {dimension_numbers = #tpu.dot_dimension_numbers<[1], [0], [0], [1], [0, 0, 1, 1], [], []>} : vector<4x64xf32>, vector<64x64xf32>, vector<4x64xf32> -> vector<4x64xf32>
    %c9_131 = arith.constant 9 : index
    %c0_132 = arith.constant 0 : index
    %196 = vector.load %arg7[%c9_131, %c0_132] : memref<16x64xf32, #tpu.memory_space<vmem>>, vector<1x64xf32>
    %197 = vector.broadcast %196 : vector<1x64xf32> to vector<4x64xf32>
    %198 = arith.addf %195, %197 : vector<4x64xf32>
    %cst_133 = arith.constant 0.000000e+00 : f32
    %199 = vector.broadcast %cst_133 : f32 to vector<4x64xf32>
    %200 = arith.subf %199, %198 : vector<4x64xf32>
    %201 = math.exp %200 : vector<4x64xf32>
    %cst_134 = arith.constant 1.000000e+00 : f32
    %202 = vector.broadcast %cst_134 : f32 to vector<4x64xf32>
    %203 = arith.addf %202, %201 : vector<4x64xf32>
    %cst_135 = arith.constant 1.160000e+03 : f32
    %204 = vector.broadcast %cst_135 : f32 to vector<4x64xf32>
    %205 = arith.divf %204, %203 : vector<4x64xf32>
    %cst_136 = arith.constant 3.400000e+02 : f32
    %206 = vector.broadcast %cst_136 : f32 to vector<4x64xf32>
    %207 = arith.addf %206, %205 : vector<4x64xf32>
    %cst_137 = arith.constant dense<0.000000e+00> : vector<64xf32>
    %208 = vector.multi_reduction <add>, %207, %cst_137 [0] : vector<4x64xf32> to vector<64xf32>
    %209 = vector.shape_cast %208 : vector<64xf32> to vector<1x64xf32>
    %cst_138 = arith.constant 4.000000e+00 : f32
    %210 = vector.broadcast %cst_138 : f32 to vector<1x64xf32>
    %211 = arith.divf %209, %210 : vector<1x64xf32>
    %c9_139 = arith.constant 9 : index
    %c0_140 = arith.constant 0 : index
    %212 = vector.load %arg8[%c9_139, %c0_140] : memref<16x64xf32, #tpu.memory_space<vmem>>, vector<1x64xf32>
    tpu.vector_store %arg8[%c9_139, %c0_140], %211 {strides = array<i32>} : memref<16x64xf32, #tpu.memory_space<vmem>>, vector<1x64xf32>,
    %c10 = arith.constant 10 : index
    %c0_141 = arith.constant 0 : index
    %c0_142 = arith.constant 0 : index
    %213 = vector.load %arg6[%c10, %c0_141, %c0_142] : memref<16x64x64xf32, #tpu.memory_space<vmem>>, vector<1x64x64xf32>
    %214 = vector.shape_cast %213 : vector<1x64x64xf32> to vector<64x64xf32>
    %cst_143 = arith.constant dense<0.000000e+00> : vector<4x64xf32>
    %215 = tpu.matmul %12, %214, %cst_143 {dimension_numbers = #tpu.dot_dimension_numbers<[1], [0], [0], [1], [0, 0, 1, 1], [], []>} : vector<4x64xf32>, vector<64x64xf32>, vector<4x64xf32> -> vector<4x64xf32>
    %c10_144 = arith.constant 10 : index
    %c0_145 = arith.constant 0 : index
    %216 = vector.load %arg7[%c10_144, %c0_145] : memref<16x64xf32, #tpu.memory_space<vmem>>, vector<1x64xf32>
    %217 = vector.broadcast %216 : vector<1x64xf32> to vector<4x64xf32>
    %218 = arith.addf %215, %217 : vector<4x64xf32>
    %cst_146 = arith.constant 0.000000e+00 : f32
    %219 = vector.broadcast %cst_146 : f32 to vector<4x64xf32>
    %220 = arith.subf %219, %218 : vector<4x64xf32>
    %221 = math.exp %220 : vector<4x64xf32>
    %cst_147 = arith.constant 1.000000e+00 : f32
    %222 = vector.broadcast %cst_147 : f32 to vector<4x64xf32>
    %223 = arith.addf %222, %221 : vector<4x64xf32>
    %cst_148 = arith.constant 1.160000e+03 : f32
    %224 = vector.broadcast %cst_148 : f32 to vector<4x64xf32>
    %225 = arith.divf %224, %223 : vector<4x64xf32>
    %cst_149 = arith.constant 3.400000e+02 : f32
    %226 = vector.broadcast %cst_149 : f32 to vector<4x64xf32>
    %227 = arith.addf %226, %225 : vector<4x64xf32>
    %cst_150 = arith.constant dense<0.000000e+00> : vector<64xf32>
    %228 = vector.multi_reduction <add>, %227, %cst_150 [0] : vector<4x64xf32> to vector<64xf32>
    %229 = vector.shape_cast %228 : vector<64xf32> to vector<1x64xf32>
    %cst_151 = arith.constant 4.000000e+00 : f32
    %230 = vector.broadcast %cst_151 : f32 to vector<1x64xf32>
    %231 = arith.divf %229, %230 : vector<1x64xf32>
    %c10_152 = arith.constant 10 : index
    %c0_153 = arith.constant 0 : index
    %232 = vector.load %arg8[%c10_152, %c0_153] : memref<16x64xf32, #tpu.memory_space<vmem>>, vector<1x64xf32>
    tpu.vector_store %arg8[%c10_152, %c0_153], %231 {strides = array<i32>} : memref<16x64xf32, #tpu.memory_space<vmem>>, vector<1x64xf32>,
    %c11 = arith.constant 11 : index
    %c0_154 = arith.constant 0 : index
    %c0_155 = arith.constant 0 : index
    %233 = vector.load %arg6[%c11, %c0_154, %c0_155] : memref<16x64x64xf32, #tpu.memory_space<vmem>>, vector<1x64x64xf32>
    %234 = vector.shape_cast %233 : vector<1x64x64xf32> to vector<64x64xf32>
    %cst_156 = arith.constant dense<0.000000e+00> : vector<4x64xf32>
    %235 = tpu.matmul %12, %234, %cst_156 {dimension_numbers = #tpu.dot_dimension_numbers<[1], [0], [0], [1], [0, 0, 1, 1], [], []>} : vector<4x64xf32>, vector<64x64xf32>, vector<4x64xf32> -> vector<4x64xf32>
    %c11_157 = arith.constant 11 : index
    %c0_158 = arith.constant 0 : index
    %236 = vector.load %arg7[%c11_157, %c0_158] : memref<16x64xf32, #tpu.memory_space<vmem>>, vector<1x64xf32>
    %237 = vector.broadcast %236 : vector<1x64xf32> to vector<4x64xf32>
    %238 = arith.addf %235, %237 : vector<4x64xf32>
    %cst_159 = arith.constant 0.000000e+00 : f32
    %239 = vector.broadcast %cst_159 : f32 to vector<4x64xf32>
    %240 = arith.subf %239, %238 : vector<4x64xf32>
    %241 = math.exp %240 : vector<4x64xf32>
    %cst_160 = arith.constant 1.000000e+00 : f32
    %242 = vector.broadcast %cst_160 : f32 to vector<4x64xf32>
    %243 = arith.addf %242, %241 : vector<4x64xf32>
    %cst_161 = arith.constant 1.160000e+03 : f32
    %244 = vector.broadcast %cst_161 : f32 to vector<4x64xf32>
    %245 = arith.divf %244, %243 : vector<4x64xf32>
    %cst_162 = arith.constant 3.400000e+02 : f32
    %246 = vector.broadcast %cst_162 : f32 to vector<4x64xf32>
    %247 = arith.addf %246, %245 : vector<4x64xf32>
    %cst_163 = arith.constant dense<0.000000e+00> : vector<64xf32>
    %248 = vector.multi_reduction <add>, %247, %cst_163 [0] : vector<4x64xf32> to vector<64xf32>
    %249 = vector.shape_cast %248 : vector<64xf32> to vector<1x64xf32>
    %cst_164 = arith.constant 4.000000e+00 : f32
    %250 = vector.broadcast %cst_164 : f32 to vector<1x64xf32>
    %251 = arith.divf %249, %250 : vector<1x64xf32>
    %c11_165 = arith.constant 11 : index
    %c0_166 = arith.constant 0 : index
    %252 = vector.load %arg8[%c11_165, %c0_166] : memref<16x64xf32, #tpu.memory_space<vmem>>, vector<1x64xf32>
    tpu.vector_store %arg8[%c11_165, %c0_166], %251 {strides = array<i32>} : memref<16x64xf32, #tpu.memory_space<vmem>>, vector<1x64xf32>,
    %c12 = arith.constant 12 : index
    %c0_167 = arith.constant 0 : index
    %c0_168 = arith.constant 0 : index
    %253 = vector.load %arg6[%c12, %c0_167, %c0_168] : memref<16x64x64xf32, #tpu.memory_space<vmem>>, vector<1x64x64xf32>
    %254 = vector.shape_cast %253 : vector<1x64x64xf32> to vector<64x64xf32>
    %cst_169 = arith.constant dense<0.000000e+00> : vector<4x64xf32>
    %255 = tpu.matmul %12, %254, %cst_169 {dimension_numbers = #tpu.dot_dimension_numbers<[1], [0], [0], [1], [0, 0, 1, 1], [], []>} : vector<4x64xf32>, vector<64x64xf32>, vector<4x64xf32> -> vector<4x64xf32>
    %c12_170 = arith.constant 12 : index
    %c0_171 = arith.constant 0 : index
    %256 = vector.load %arg7[%c12_170, %c0_171] : memref<16x64xf32, #tpu.memory_space<vmem>>, vector<1x64xf32>
    %257 = vector.broadcast %256 : vector<1x64xf32> to vector<4x64xf32>
    %258 = arith.addf %255, %257 : vector<4x64xf32>
    %cst_172 = arith.constant 0.000000e+00 : f32
    %259 = vector.broadcast %cst_172 : f32 to vector<4x64xf32>
    %260 = arith.subf %259, %258 : vector<4x64xf32>
    %261 = math.exp %260 : vector<4x64xf32>
    %cst_173 = arith.constant 1.000000e+00 : f32
    %262 = vector.broadcast %cst_173 : f32 to vector<4x64xf32>
    %263 = arith.addf %262, %261 : vector<4x64xf32>
    %cst_174 = arith.constant 1.160000e+03 : f32
    %264 = vector.broadcast %cst_174 : f32 to vector<4x64xf32>
    %265 = arith.divf %264, %263 : vector<4x64xf32>
    %cst_175 = arith.constant 3.400000e+02 : f32
    %266 = vector.broadcast %cst_175 : f32 to vector<4x64xf32>
    %267 = arith.addf %266, %265 : vector<4x64xf32>
    %cst_176 = arith.constant dense<0.000000e+00> : vector<64xf32>
    %268 = vector.multi_reduction <add>, %267, %cst_176 [0] : vector<4x64xf32> to vector<64xf32>
    %269 = vector.shape_cast %268 : vector<64xf32> to vector<1x64xf32>
    %cst_177 = arith.constant 4.000000e+00 : f32
    %270 = vector.broadcast %cst_177 : f32 to vector<1x64xf32>
    %271 = arith.divf %269, %270 : vector<1x64xf32>
    %c12_178 = arith.constant 12 : index
    %c0_179 = arith.constant 0 : index
    %272 = vector.load %arg8[%c12_178, %c0_179] : memref<16x64xf32, #tpu.memory_space<vmem>>, vector<1x64xf32>
    tpu.vector_store %arg8[%c12_178, %c0_179], %271 {strides = array<i32>} : memref<16x64xf32, #tpu.memory_space<vmem>>, vector<1x64xf32>,
    %c13 = arith.constant 13 : index
    %c0_180 = arith.constant 0 : index
    %c0_181 = arith.constant 0 : index
    %273 = vector.load %arg6[%c13, %c0_180, %c0_181] : memref<16x64x64xf32, #tpu.memory_space<vmem>>, vector<1x64x64xf32>
    %274 = vector.shape_cast %273 : vector<1x64x64xf32> to vector<64x64xf32>
    %cst_182 = arith.constant dense<0.000000e+00> : vector<4x64xf32>
    %275 = tpu.matmul %12, %274, %cst_182 {dimension_numbers = #tpu.dot_dimension_numbers<[1], [0], [0], [1], [0, 0, 1, 1], [], []>} : vector<4x64xf32>, vector<64x64xf32>, vector<4x64xf32> -> vector<4x64xf32>
    %c13_183 = arith.constant 13 : index
    %c0_184 = arith.constant 0 : index
    %276 = vector.load %arg7[%c13_183, %c0_184] : memref<16x64xf32, #tpu.memory_space<vmem>>, vector<1x64xf32>
    %277 = vector.broadcast %276 : vector<1x64xf32> to vector<4x64xf32>
    %278 = arith.addf %275, %277 : vector<4x64xf32>
    %cst_185 = arith.constant 0.000000e+00 : f32
    %279 = vector.broadcast %cst_185 : f32 to vector<4x64xf32>
    %280 = arith.subf %279, %278 : vector<4x64xf32>
    %281 = math.exp %280 : vector<4x64xf32>
    %cst_186 = arith.constant 1.000000e+00 : f32
    %282 = vector.broadcast %cst_186 : f32 to vector<4x64xf32>
    %283 = arith.addf %282, %281 : vector<4x64xf32>
    %cst_187 = arith.constant 1.160000e+03 : f32
    %284 = vector.broadcast %cst_187 : f32 to vector<4x64xf32>
    %285 = arith.divf %284, %283 : vector<4x64xf32>
    %cst_188 = arith.constant 3.400000e+02 : f32
    %286 = vector.broadcast %cst_188 : f32 to vector<4x64xf32>
    %287 = arith.addf %286, %285 : vector<4x64xf32>
    %cst_189 = arith.constant dense<0.000000e+00> : vector<64xf32>
    %288 = vector.multi_reduction <add>, %287, %cst_189 [0] : vector<4x64xf32> to vector<64xf32>
    %289 = vector.shape_cast %288 : vector<64xf32> to vector<1x64xf32>
    %cst_190 = arith.constant 4.000000e+00 : f32
    %290 = vector.broadcast %cst_190 : f32 to vector<1x64xf32>
    %291 = arith.divf %289, %290 : vector<1x64xf32>
    %c13_191 = arith.constant 13 : index
    %c0_192 = arith.constant 0 : index
    %292 = vector.load %arg8[%c13_191, %c0_192] : memref<16x64xf32, #tpu.memory_space<vmem>>, vector<1x64xf32>
    tpu.vector_store %arg8[%c13_191, %c0_192], %291 {strides = array<i32>} : memref<16x64xf32, #tpu.memory_space<vmem>>, vector<1x64xf32>,
    %c14 = arith.constant 14 : index
    %c0_193 = arith.constant 0 : index
    %c0_194 = arith.constant 0 : index
    %293 = vector.load %arg6[%c14, %c0_193, %c0_194] : memref<16x64x64xf32, #tpu.memory_space<vmem>>, vector<1x64x64xf32>
    %294 = vector.shape_cast %293 : vector<1x64x64xf32> to vector<64x64xf32>
    %cst_195 = arith.constant dense<0.000000e+00> : vector<4x64xf32>
    %295 = tpu.matmul %12, %294, %cst_195 {dimension_numbers = #tpu.dot_dimension_numbers<[1], [0], [0], [1], [0, 0, 1, 1], [], []>} : vector<4x64xf32>, vector<64x64xf32>, vector<4x64xf32> -> vector<4x64xf32>
    %c14_196 = arith.constant 14 : index
    %c0_197 = arith.constant 0 : index
    %296 = vector.load %arg7[%c14_196, %c0_197] : memref<16x64xf32, #tpu.memory_space<vmem>>, vector<1x64xf32>
    %297 = vector.broadcast %296 : vector<1x64xf32> to vector<4x64xf32>
    %298 = arith.addf %295, %297 : vector<4x64xf32>
    %cst_198 = arith.constant 0.000000e+00 : f32
    %299 = vector.broadcast %cst_198 : f32 to vector<4x64xf32>
    %300 = arith.subf %299, %298 : vector<4x64xf32>
    %301 = math.exp %300 : vector<4x64xf32>
    %cst_199 = arith.constant 1.000000e+00 : f32
    %302 = vector.broadcast %cst_199 : f32 to vector<4x64xf32>
    %303 = arith.addf %302, %301 : vector<4x64xf32>
    %cst_200 = arith.constant 1.160000e+03 : f32
    %304 = vector.broadcast %cst_200 : f32 to vector<4x64xf32>
    %305 = arith.divf %304, %303 : vector<4x64xf32>
    %cst_201 = arith.constant 3.400000e+02 : f32
    %306 = vector.broadcast %cst_201 : f32 to vector<4x64xf32>
    %307 = arith.addf %306, %305 : vector<4x64xf32>
    %cst_202 = arith.constant dense<0.000000e+00> : vector<64xf32>
    %308 = vector.multi_reduction <add>, %307, %cst_202 [0] : vector<4x64xf32> to vector<64xf32>
    %309 = vector.shape_cast %308 : vector<64xf32> to vector<1x64xf32>
    %cst_203 = arith.constant 4.000000e+00 : f32
    %310 = vector.broadcast %cst_203 : f32 to vector<1x64xf32>
    %311 = arith.divf %309, %310 : vector<1x64xf32>
    %c14_204 = arith.constant 14 : index
    %c0_205 = arith.constant 0 : index
    %312 = vector.load %arg8[%c14_204, %c0_205] : memref<16x64xf32, #tpu.memory_space<vmem>>, vector<1x64xf32>
    tpu.vector_store %arg8[%c14_204, %c0_205], %311 {strides = array<i32>} : memref<16x64xf32, #tpu.memory_space<vmem>>, vector<1x64xf32>,
    %c15 = arith.constant 15 : index
    %c0_206 = arith.constant 0 : index
    %c0_207 = arith.constant 0 : index
    %313 = vector.load %arg6[%c15, %c0_206, %c0_207] : memref<16x64x64xf32, #tpu.memory_space<vmem>>, vector<1x64x64xf32>
    %314 = vector.shape_cast %313 : vector<1x64x64xf32> to vector<64x64xf32>
    %cst_208 = arith.constant dense<0.000000e+00> : vector<4x64xf32>
    %315 = tpu.matmul %12, %314, %cst_208 {dimension_numbers = #tpu.dot_dimension_numbers<[1], [0], [0], [1], [0, 0, 1, 1], [], []>} : vector<4x64xf32>, vector<64x64xf32>, vector<4x64xf32> -> vector<4x64xf32>
    %c15_209 = arith.constant 15 : index
    %c0_210 = arith.constant 0 : index
    %316 = vector.load %arg7[%c15_209, %c0_210] : memref<16x64xf32, #tpu.memory_space<vmem>>, vector<1x64xf32>
    %317 = vector.broadcast %316 : vector<1x64xf32> to vector<4x64xf32>
    %318 = arith.addf %315, %317 : vector<4x64xf32>
    %cst_211 = arith.constant 0.000000e+00 : f32
    %319 = vector.broadcast %cst_211 : f32 to vector<4x64xf32>
    %320 = arith.subf %319, %318 : vector<4x64xf32>
    %321 = math.exp %320 : vector<4x64xf32>
    %cst_212 = arith.constant 1.000000e+00 : f32
    %322 = vector.broadcast %cst_212 : f32 to vector<4x64xf32>
    %323 = arith.addf %322, %321 : vector<4x64xf32>
    %cst_213 = arith.constant 1.160000e+03 : f32
    %324 = vector.broadcast %cst_213 : f32 to vector<4x64xf32>
    %325 = arith.divf %324, %323 : vector<4x64xf32>
    %cst_214 = arith.constant 3.400000e+02 : f32
    %326 = vector.broadcast %cst_214 : f32 to vector<4x64xf32>
    %327 = arith.addf %326, %325 : vector<4x64xf32>
    %cst_215 = arith.constant dense<0.000000e+00> : vector<64xf32>
    %328 = vector.multi_reduction <add>, %327, %cst_215 [0] : vector<4x64xf32> to vector<64xf32>
    %329 = vector.shape_cast %328 : vector<64xf32> to vector<1x64xf32>
    %cst_216 = arith.constant 4.000000e+00 : f32
    %330 = vector.broadcast %cst_216 : f32 to vector<1x64xf32>
    %331 = arith.divf %329, %330 : vector<1x64xf32>
    %c15_217 = arith.constant 15 : index
    %c0_218 = arith.constant 0 : index
    %332 = vector.load %arg8[%c15_217, %c0_218] : memref<16x64xf32, #tpu.memory_space<vmem>>, vector<1x64xf32>
    tpu.vector_store %arg8[%c15_217, %c0_218], %331 {strides = array<i32>} : memref<16x64xf32, #tpu.memory_space<vmem>>, vector<1x64xf32>,
    return
  }
  func.func @transform_0(%arg0: i32) -> (i32, i32) {
    %c0_i32 = arith.constant 0 : i32
    %c0_i32_0 = arith.constant 0 : i32
    %c0_i32_1 = arith.constant 0 : i32
    return %c0_i32, %c0_i32_0 : i32, i32
  }
  func.func @transform_1(%arg0: i32) -> (i32, i32) {
    %c0_i32 = arith.constant 0 : i32
    %c0_i32_0 = arith.constant 0 : i32
    %c0_i32_1 = arith.constant 0 : i32
    return %c0_i32, %c0_i32_0 : i32, i32
  }
  func.func @transform_2(%arg0: i32) -> (i32, i32) {
    %c0_i32 = arith.constant 0 : i32
    %c0_i32_0 = arith.constant 0 : i32
    %c0_i32_1 = arith.constant 0 : i32
    return %c0_i32, %c0_i32_0 : i32, i32
  }
  func.func @transform_3(%arg0: i32) -> (i32, i32) {
    %c0_i32 = arith.constant 0 : i32
    %c0_i32_0 = arith.constant 0 : i32
    %c0_i32_1 = arith.constant 0 : i32
    return %c0_i32, %c0_i32_0 : i32, i32
  }
  func.func @transform_4(%arg0: i32) -> (i32, i32) {
    %c0_i32 = arith.constant 0 : i32
    %c0_i32_0 = arith.constant 0 : i32
    %c0_i32_1 = arith.constant 0 : i32
    return %c0_i32, %c0_i32_0 : i32, i32
  }
  func.func @transform_5(%arg0: i32) -> (i32, i32, i32) {
    %c0_i32 = arith.constant 0 : i32
    %c0_i32_0 = arith.constant 0 : i32
    %c0_i32_1 = arith.constant 0 : i32
    return %arg0, %c0_i32, %c0_i32_0 : i32, i32, i32
  }
  func.func @transform_6(%arg0: i32) -> (i32, i32) {
    %c0_i32 = arith.constant 0 : i32
    %c0_i32_0 = arith.constant 0 : i32
    return %arg0, %c0_i32 : i32, i32
  }
  func.func @transform_7(%arg0: i32) -> (i32, i32) {
    %c0_i32 = arith.constant 0 : i32
    %c0_i32_0 = arith.constant 0 : i32
    return %arg0, %c0_i32 : i32, i32
  }
}

</mosaic_0001>

<bundles_post_ra>
// kernel: tpu_custom_call.1
= control target key start
LH: loop header
LB: loop body
LE: loop exit
PB: predicated region body
PF: predicated region fallthrough
CT: control target
= control target key end

     0   :  { %s4453_s0 = inlined_call_operand.hbm [shape: f32[4,48], index: 0, kind: input, shape index: {}]   ;;  %s4454_s1 = inlined_call_operand.hbm [shape: f32[48,64], index: 1, kind: input, shape index: {}]   ;;  %s4455_s2 = inlined_call_operand.hbm [shape: f32[1,64], index: 2, kind: input, shape index: {}]   ;;  %s4456_s3 = inlined_call_operand.hbm [shape: f32[64,64], index: 3, kind: input, shape index: {}]   ;;  %s4457_s4 = inlined_call_operand.hbm [shape: f32[1,64], index: 4, kind: input, shape index: {}]   ;;  %s4458_s5 = inlined_call_operand.hbm [shape: f32[64,64,64], index: 5, kind: input, shape index: {}]   ;;  %s4459_s6 = inlined_call_operand.hbm [shape: f32[64,64], index: 6, kind: input, shape index: {}]   ;;  %s4460_s7 = inlined_call_operand.hbm [shape: f32[64,64], index: 7, kind: output, shape index: {}]  }
   0x1   :  { %4479 = sst [smem:[#allocation25_spill]] %s4453_s0 }
   0x2   :  { %4480 = sst [smem:[#allocation26_spill]] %s4454_s1 }
   0x3   :  { %4481 = sst [smem:[#allocation27_spill]] %s4456_s3 }
   0x4   :  { %4482 = sst [smem:[#allocation28_spill]] %s4458_s5 }
   0x5   :  { %12 = vsyncpa [#allocation3], 0 }
   0x6   :  { %13 = vsyncpa [#allocation6], 0 }
   0x7   :  { %14 = vsyncpa [#allocation9], 0 }
   0x8   :  { %15 = vsyncpa [#allocation12], 0 }
   0x9   :  { %17 = vsyncpa [#allocation12 + $0x1], 0 }
   0xa   :  { %18 = vsyncpa [#allocation4], 0 }
   0xb   :  { %20 = vsyncpa [#allocation4 + $0x1], 0  ;;  %s3758_s24 = smov 0   ;;  %s3760_s25 = smov 0  }
   0xc   :  { %s3762_s26 = smov 0   ;;  %s3764_s27 = smov 0  }
   0xd LB: > { %4483 = sst [smem:[#allocation20_spill]] %s3689_s24  ;;  %s3703_s28 = smov [#allocation5]   ;;  %s3701_s27 = sphi %s3764_s27, %s4518_s27   ;;  %s3697_s26 = sphi %s3762_s26, %s4520_s26   ;;  %s3693_s25 = sphi %s3760_s25, %s4522_s25   ;;  %s3689_s24 = sphi %s3758_s24, %s4521_s24  }
   0xe   : > { %4484 = sst [smem:[#allocation21_spill]] %s3697_s26  ;;  %s237_s29 = sshll.u32 %s3703_s28, 4  ;;  %s3784_s29 = int_to_ptr.vmem [resolvable:$true] %s237_s29 }
   0xf   : > { %s3779_s30 = sadd.s32 4294967295, %s3701_s27   ;;  %p2347_p0 = scmp.ge.s32.totalorder %s3701_s27, 1 }
  0x10   : > { %p4465_p1 = scmp.eq.s32.totalorder %s3779_s30, 0  ;;  %p214_p2 = scmp.lt.s32.totalorder %s3701_s27, 5 }
  0x11   : > { %s3704_s9 = smov [#allocation8]   ;;  %s4487_s1 = sld [smem:[#allocation26_spill]] }
  0x12   : > { %p3786_p3 = pnand %p2347_p0, %p214_p2  ;;  %s261_s10 = sshll.u32 %s3704_s9, 4  ;;  %s3798_s10 = int_to_ptr.vmem [resolvable:$true] %s261_s10 }
  0x14   : > { %s4485_s8 = scalar_select %p3786_p3, 1, 0 }
  0x15   : > { %p3272_p4 = pneg %p3786_p3 }
  0x17   : > { %p3794_p5 = pnand %p3272_p4, %p4465_p1  ;;  %s3423_s14 = scalar_lea.hbm %s4487_s1, 768 }
  0x18   : > { %p3424_p6 = scmp.ne.s32.totalorder %s4487_s1, %s3423_s14  ;;  %p3430_p10 = scmp.lt.u32.totalorder %s3423_s14, %s4487_s1 }
  0x19   : > { %s4486_s11 = scalar_select %p3794_p5, 1, 0 }
  0x1a   : > { %p3808_p7 = pneg %p3794_p5 }
  0x1c   : > { %p3426_p8 = pnand %p3808_p7, %p3424_p6 }
  0x1e   : > { %p3427_p9 = pneg %p3426_p8 }
  0x20   : > { %p3432_p11 = pnand %p3430_p10, %p3427_p9 }
  0x22   : > { %3435 = shalt.err (!%p3432_p11)
}
  0x23   : > { %s3436_s20 = scalar_lea.vmem %s3784_s29, 768  ;;  %p3444_p2 = scmp.lt.s32.totalorder %s3784_s29, %s3784_s29 }
  0x24   : > { %p3437_p12 = scmp.ne.s32.totalorder %s3784_s29, %s3436_s20  ;;  %p3445_p4 = scmp.lt.s32.totalorder %s3436_s20, %s3436_s20 }
  0x26   : > { %p3439_p13 = pnand %p3437_p12, %p3808_p7  ;;  %p3446_p6 = por %p3445_p4, %p3444_p2 }
  0x28   : > { %p3440_p0 = pneg %p3439_p13 }
  0x2a   : > { %p3447_p8 = pnand %p3446_p6, %p3440_p0 }
  0x2c   : > { %3450 = shalt.err (!%p3447_p8)
}
  0x2d   : > { %s4461_s21 = smov 128   ;;  %s4463_s22 = smov 8  }
  0x2e   : > { %3278 = dma.hbm_to_vmem [thread:$0]  (!%p3794_p5), %s4487_s1, 768, %s3784_s29, [#allocation6], %s4461_s21, %s4461_s21, %s4463_s22  }
  0x2f   : > { %s4489_s3 = sld [smem:[#allocation27_spill]] }
  0x35   : > { %s3451_s13 = scalar_lea.hbm %s4489_s3, 1024 }
  0x36   : > { %p3452_p9 = scmp.ne.s32.totalorder %s4489_s3, %s3451_s13  ;;  %p3458_p12 = scmp.lt.u32.totalorder %s3451_s13, %s4489_s3 }
  0x38   : > { %p3454_p10 = pnand %p3452_p9, %p3808_p7 }
  0x3a   : > { %p3455_p11 = pneg %p3454_p10 }
  0x3c   : > { %p3460_p13 = pnand %p3458_p12, %p3455_p11 }
  0x3e   : > { %3463 = shalt.err (!%p3460_p13)
}
  0x3f   : > { %s3464_s29 = scalar_lea.vmem %s3798_s10, 1024  ;;  %p3472_p6 = scmp.lt.s32.totalorder %s3798_s10, %s3798_s10 }
  0x40   : > { %p3465_p0 = scmp.ne.s32.totalorder %s3798_s10, %s3464_s29  ;;  %p3473_p8 = scmp.lt.s32.totalorder %s3464_s29, %s3464_s29 }
  0x42   : > { %p3467_p2 = pnand %p3465_p0, %p3808_p7  ;;  %p3474_p9 = por %p3473_p8, %p3472_p6 }
  0x44   : > { %p3468_p4 = pneg %p3467_p2 }
  0x46   : > { %p3475_p10 = pnand %p3474_p9, %p3468_p4 }
  0x48   : > { %3478 = shalt.err (!%p3475_p10)
}
  0x49   : > { %3284 = dma.hbm_to_vmem [thread:$0]  (!%p3794_p5), %s4489_s3, 1024, %s3798_s10, [#allocation9], %s4461_s21, %s4461_s21, %s4463_s22  }
  0x4a   : > { %s2346_s23 = sadd.s32 4294967294, %s3701_s27   ;;  %s3860_s28 = sadd.s32 1, %s3701_s27  }
  0x4b   : > { %4490 = sst [smem:[#allocation22_spill]] %s3860_s28  ;;  %s135_s9 = ssub.s32 %s3701_s27, %s3860_s28 }
  0x4c   : > { %s138_s12 = sadd.s32 1, %s3697_s26  ;;  %p136_p11 = scmp.eq.s32.totalorder %s135_s9, 0 }
  0x4d   : > { %p145_p12 = scmp.ne.s32.totalorder %s3697_s26, %s3693_s25  ;;  %p146_p13 = scmp.eq.s32.totalorder %s3701_s27, 0 }
  0x4e   : > { %p151_p0 = scmp.ne.s32.totalorder %s3693_s25, %s3689_s24  ;;  %p201_p6 = scmp.eq.s32.totalorder %s3779_s30, 3 }
  0x4f   : > { %s3871_s13 = scalar_select %p136_p11, %s3697_s26, %s138_s12  }
  0x50   : > { %p3873_p2 = por %p146_p13, %p145_p12  ;;  %p3879_p4 = por %p4465_p1, %p151_p0 }
  0x51   : > { %4491 = sst [smem:[#allocation23_spill]] %s3871_s13  ;;  %p207_p8 = scmp.eq.s32.totalorder %s2346_s23, 3 }
  0x52   : > { %s4493_s10 = scalar_select %p3879_p4, 1, 0 }
  0x53   : > { %p3304_p9 = scmp.lt.s32.totalorder %s3701_s27, 4  ;;  %s286_s15 = sand.u32 1, %s3701_s27  }
  0x54   : > { %p3886_p10 = por %p201_p6, %p145_p12  ;;  %p3890_p11 = por %p207_p8, %p151_p0 }
  0x55   : > { %s288_s29 = sand.u32 1, %s3697_s26   ;;  %s2532_s20 = sshll.u32 %s3701_s27, 14 }
  0x56   : > { %s4494_s16 = scalar_select %p3886_p10, 1, 0 }
  0x57   : > { %s4495_s18 = scalar_select %p3890_p11, 1, 0 }
  0x58   : > { %s2354_s19 = sshll.u32 %s288_s29, 10  ;;  %s4497_s5 = sld [smem:[#allocation28_spill]] }
  0x59   : > { %4496 = sst [smem:[#allocation24_spill]] %s4495_s18  ;;  %s290_s23 = scalar_lea.vmem [#allocation11], %s2354_s19 }
  0x5a   : > { %s298_s22 = sshll.u32 %s290_s23, 4  ;;  %p3903_p12 = pnand %p3304_p9, %p3873_p2  ;;  %s3907_s22 = int_to_ptr.vmem [resolvable:$true] %s298_s22 }
  0x5b   : > { %s3909_s3 = sshll.u32 %s288_s29, 4  ;;  %s3911_s9 = scalar_lea.sflag [#allocation12], %s286_s15 }
  0x5c   : > { %s4498_s1 = scalar_select %p3903_p12, 1, 0 }
  0x5d   : > { %p4476_p0 = pneg %p3903_p12 }
  0x5e   : > { %s3899_s21 = scalar_lea.hbm %s4497_s5, %s2532_s20  ;;  %s3484_s12 = scalar_lea.hbm %s4497_s5, 65536 }
  0x5f   : > { %s3479_s20 = scalar_lea.hbm %s3899_s21, 16384  ;;  %p3485_p2 = scmp.lt.u32.totalorder %s3899_s21, %s4497_s5 }
  0x60   : > { %p3480_p13 = scmp.ne.s32.totalorder %s3899_s21, %s3479_s20  ;;  %p3486_p9 = scmp.lt.u32.totalorder %s3484_s12, %s3479_s20 }
  0x61   : > { %p3488_p11 = scmp.lt.u32.totalorder %s3479_s20, %s3899_s21 }
  0x62   : > { %p3482_p6 = pnand %p4476_p0, %p3480_p13  ;;  %p3487_p1 = por %p3486_p9, %p3485_p2 }
  0x64   : > { %p3483_p8 = pneg %p3482_p6  ;;  %p3489_p10 = por %p3488_p11, %p3487_p1 }
  0x66   : > { %p3490_p4 = pnand %p3489_p10, %p3483_p8 }
  0x68   : > { %3493 = shalt.err (!%p3490_p4)
}
  0x69   : > { %s3494_s15 = scalar_lea.vmem %s3907_s22, 16384  ;;  %s3707_s29 = smov [#allocation11]  }
  0x6a   : > { %p3495_p13 = scmp.ne.s32.totalorder %s3907_s22, %s3494_s15  ;;  %s3499_s14 = sshll.u32 %s3707_s29, 4  ;;  %s3500_s14 = int_to_ptr.vmem [resolvable:$false] %s3499_s14 }
  0x6b   : > { %s3501_s13 = scalar_lea.vmem %s3500_s14, 32768  ;;  %p3502_p5 = scmp.lt.s32.totalorder %s3907_s22, %s3500_s14 }
  0x6c   : > { %p3497_p6 = pnand %p3495_p13, %p4476_p0  ;;  %p3503_p2 = scmp.lt.s32.totalorder %s3501_s13, %s3494_s15 }
  0x6e   : > { %p3498_p3 = pneg %p3497_p6  ;;  %p3504_p9 = por %p3503_p2, %p3502_p5 }
  0x70   : > { %p3505_p1 = pnand %p3504_p9, %p3498_p3 }
  0x72   : > { %3508 = shalt.err (!%p3505_p1)
}
  0x73   : > { %s4499_s20 = smov 8   ;;  %s4500_s19 = smov 128  }
  0x74   : > { %3291 = dma.hbm_to_vmem [thread:$0]  (!%p3903_p12), %s3899_s21, 16384, %s3907_s22, %s3911_s9, %s4500_s19, %s4500_s19, %s4499_s20  }
  0x75   : > { %s312_s12 = scalar_lea.vmem [#allocation13], %s3909_s3  ;;  %s3708_s29 = smov [#allocation2]  }
  0x76   : > { %s3943_s23 = sshll.u32 %s312_s12, 4  ;;  %s227_s14 = sshll.u32 %s3708_s29, 4  ;;  %s228_s14 = int_to_ptr.vmem [resolvable:$true] %s227_s14  ;;  %s4006_s23 = int_to_ptr.vmem [resolvable:$true] %s3943_s23 }
  0x77   : > { %s3709_s15 = smov [#allocation7]   ;;  %s4501_s0 = sld [smem:[#allocation25_spill]] }
  0x78   : > { %s251_s13 = sshll.u32 %s3709_s15, 4  ;;  %s252_s13 = int_to_ptr.vmem [resolvable:$true] %s251_s13 }
  0x7d   : > { %s3509_s28 = scalar_lea.hbm %s4501_s0, 64 }
  0x7e   : > { %p3510_p3 = scmp.ne.s32.totalorder %s4501_s0, %s3509_s28  ;;  %p3516_p10 = scmp.lt.u32.totalorder %s3509_s28, %s4501_s0 }
  0x80   : > { %p3512_p5 = pnand %p3510_p3, %p3808_p7 }
  0x82   : > { %p3513_p4 = pneg %p3512_p5 }
  0x84   : > { %p3518_p11 = pnand %p3516_p10, %p3513_p4 }
  0x86   : > { %3521 = shalt.err (!%p3518_p11)
}
  0x87   : > { %s3522_s22 = scalar_lea.vmem %s228_s14, 64  ;;  %p3530_p2 = scmp.lt.s32.totalorder %s228_s14, %s228_s14 }
  0x88   : > { %p3523_p8 = scmp.ne.s32.totalorder %s228_s14, %s3522_s22  ;;  %p3531_p9 = scmp.lt.s32.totalorder %s3522_s22, %s3522_s22 }
  0x8a   : > { %p3525_p13 = pnand %p3523_p8, %p3808_p7  ;;  %p3532_p1 = por %p3531_p9, %p3530_p2 }
  0x8c   : > { %p3526_p6 = pneg %p3525_p13 }
  0x8e   : > { %p3533_p0 = pnand %p3532_p1, %p3526_p6 }
  0x90   : > { %3536 = shalt.err (!%p3533_p0)
}
  0x91   : > { %p4502_p3 = scmp.ne.s32.totalorder %s4486_s11, 0  ;;  %s3537_s18 = scalar_lea.hbm %s4455_s2, 16 }
  0x92   : > { %p3538_p5 = scmp.ne.s32.totalorder %s4455_s2, %s3537_s18  ;;  %p3544_p0 = scmp.lt.u32.totalorder %s3537_s18, %s4455_s2 }
  0x93   : > { %3275 = dma.hbm_to_vmem [thread:$0]  (!%p4502_p3), %s4501_s0, 64, %s228_s14, [#allocation3]  }
  0x94   : > { %p3540_p4 = pnand %p3538_p5, %p3808_p7 }
  0x96   : > { %p3541_p10 = pneg %p3540_p4 }
  0x98   : > { %p3546_p11 = pnand %p3544_p0, %p3541_p10 }
  0x9a   : > { %3549 = shalt.err (!%p3546_p11)
}
  0x9b   : > { %s3550_s3 = scalar_lea.vmem %s252_s13, 16  ;;  %s3557_s14 = scalar_lea.vmem %s252_s13, 32 }
  0x9c   : > { %p3551_p8 = scmp.ne.s32.totalorder %s252_s13, %s3550_s3  ;;  %p3558_p2 = scmp.lt.s32.totalorder %s252_s13, %s252_s13 }
  0x9d   : > { %p3559_p9 = scmp.lt.s32.totalorder %s3557_s14, %s3550_s3 }
  0x9e   : > { %p3553_p13 = pnand %p3551_p8, %p3808_p7 }
  0x9f   : > { %p3560_p1 = por %p3559_p9, %p3558_p2 }
  0xa0   : > { %p3554_p6 = pneg %p3553_p13 }
  0xa2   : > { %p3561_p12 = pnand %p3560_p1, %p3554_p6 }
  0xa4   : > { %3564 = shalt.err (!%p3561_p12)
}
  0xa5   : > { %3281 = dma.hbm_to_vmem [thread:$0]  (!%p4502_p3), %s4455_s2, 16, %s252_s13, [#allocation6]  }
  0xa6   : > { %s3710_s24 = smov [#allocation10]   ;;  %s2533_s28 = sshll.u32 %s3701_s27, 8 }
  0xa7   : > { %s275_s26 = sshll.u32 %s3710_s24, 4  ;;  %s3985_s29 = scalar_lea.hbm %s4459_s6, %s2533_s28  ;;  %s276_s26 = int_to_ptr.vmem [resolvable:$true] %s275_s26 }
  0xa8   : > { %s3565_s3 = scalar_lea.hbm %s4457_s4, 16 }
  0xa9   : > { %p3566_p12 = scmp.ne.s32.totalorder %s4457_s4, %s3565_s3  ;;  %p3572_p10 = scmp.lt.u32.totalorder %s3565_s3, %s4457_s4 }
  0xab   : > { %p3568_p5 = pnand %p3566_p12, %p3808_p7 }
  0xad   : > { %p3569_p4 = pneg %p3568_p5 }
  0xaf   : > { %p3574_p0 = pnand %p3572_p10, %p3569_p4 }
  0xb1   : > { %3577 = shalt.err (!%p3574_p0)
}
  0xb2   : > { %s3578_s5 = scalar_lea.vmem %s276_s26, 16  ;;  %s3585_s24 = scalar_lea.vmem %s276_s26, 32 }
  0xb3   : > { %p3579_p11 = scmp.ne.s32.totalorder %s276_s26, %s3578_s5  ;;  %p3586_p6 = scmp.lt.s32.totalorder %s276_s26, %s276_s26 }
  0xb4   : > { %p3587_p2 = scmp.lt.s32.totalorder %s3585_s24, %s3578_s5 }
  0xb5   : > { %p3581_p8 = pnand %p3579_p11, %p3808_p7 }
  0xb6   : > { %p3588_p9 = por %p3587_p2, %p3586_p6 }
  0xb7   : > { %p3582_p13 = pneg %p3581_p8 }
  0xb9   : > { %p3589_p1 = pnand %p3588_p9, %p3582_p13 }
  0xbb   : > { %3592 = shalt.err (!%p3589_p1)
}
  0xbc   : > { %3287 = dma.hbm_to_vmem [thread:$0]  (!%p4502_p3), %s4457_s4, 16, %s276_s26, [#allocation9]  }
  0xbd   : > { %s3593_s17 = scalar_lea.hbm %s3985_s29, 256  ;;  %p4503_p12 = scmp.ne.s32.totalorder %s4498_s1, 0 }
  0xbe   : > { %p3594_p7 = scmp.ne.s32.totalorder %s3985_s29, %s3593_s17  ;;  %s3598_s12 = scalar_lea.hbm %s4459_s6, 1024 }
  0xbf   : > { %p4504_p5 = pneg %p4503_p12  ;;  %p3599_p0 = scmp.lt.u32.totalorder %s3985_s29, %s4459_s6 }
  0xc0   : > { %p3600_p11 = scmp.lt.u32.totalorder %s3598_s12, %s3593_s17  ;;  %p3602_p13 = scmp.lt.u32.totalorder %s3593_s17, %s3985_s29 }
  0xc1   : > { %p3596_p4 = pnand %p3594_p7, %p4504_p5 }
  0xc2   : > { %p3601_p8 = por %p3600_p11, %p3599_p0 }
  0xc3   : > { %p3597_p10 = pneg %p3596_p4 }
  0xc4   : > { %p3603_p3 = por %p3602_p13, %p3601_p8 }
  0xc6   : > { %p3604_p6 = pnand %p3603_p3, %p3597_p10 }
  0xc8   : > { %3607 = shalt.err (!%p3604_p6)
}
  0xc9   : > { %s3608_s26 = scalar_lea.vmem %s4006_s23, 256  ;;  %p4505_p9 = pmov %p4504_p5 }
  0xca   : > { %p3609_p2 = scmp.ne.s32.totalorder %s4006_s23, %s3608_s26  ;;  %s3711_s3 = smov [#allocation13]  }
  0xcb   : > { %s3613_s14 = sshll.u32 %s3711_s3, 4  ;;  %s3614_s14 = int_to_ptr.vmem [resolvable:$false] %s3613_s14 }
  0xcc   : > { %p3611_p1 = pnand %p3609_p2, %p4505_p9  ;;  %s3615_s13 = scalar_lea.vmem %s3614_s14, 512 }
  0xcd   : > { %p3616_p5 = scmp.lt.s32.totalorder %s4006_s23, %s3614_s14  ;;  %p3617_p4 = scmp.lt.s32.totalorder %s3615_s13, %s3608_s26 }
  0xce   : > { %p3612_p7 = pneg %p3611_p1 }
  0xcf   : > { %p3618_p0 = por %p3617_p4, %p3616_p5 }
  0xd1   : > { %p3619_p11 = pnand %p3618_p0, %p3612_p7 }
  0xd3   : > { %3622 = shalt.err (!%p3619_p11)
}
  0xd4   : > { %3294 = dma.hbm_to_vmem [thread:$0]  (!%p4503_p12), %s3985_s29, 256, %s4006_s23, %s3911_s9, %s4500_s19, %s4500_s19, %s4499_s20  }
  0xd5   : > { %p4506_p10 = scmp.ne.s32.totalorder %s4485_s8, 0 }
  0xd6   : > { %p4507_p8 = scmp.eq.s32.totalorder (!%p4506_p10), %s3779_s30, 0 }
  0xd7   : > { %331 = sbr.rel (%p4506_p10) target bundleno = 1087 (0x43f), region = 48 }
  0xde   : > { %3668 = dma.done.wait (%p4507_p8), [#allocation3], 64   ;;  %p4508_p13 = pmov %p4507_p8 }
  0xdf   : > { %p4509_p3 = pmov %p4507_p8 }
  0xe0   : > { %3670 = vsyncadd (%p4508_p13), [#allocation3], 4294967232 }
  0xe1   : > { %3672 = dma.done.wait (%p4509_p3), [#allocation6], 784   ;;  %p4510_p6 = pmov %p4509_p3 }
  0xe2   : > { %p4511_p2 = pmov %p4509_p3 }
  0xe3   : > { %3674 = vsyncadd (%p4510_p6), [#allocation6], 4294966512 }
  0xe4   : > { %3676 = dma.done.wait (%p4511_p2), [#allocation9], 1040   ;;  %p4512_p12 = pmov %p4511_p2 }
  0xe5   : > { %s353_s1 = sand.u32 1, %s3779_s30   ;;  %s4051_s8 = sand.u32 1, %s3693_s25  }
  0xe6   : > { %3678 = vsyncadd (%p4512_p12), [#allocation9], 4294966256  ;;  %s2367_s9 = sshll.u32 %s4051_s8, 10  ;;  %s354_s20 = scalar_lea.sflag [#allocation12], %s353_s1 }
  0xe7   : > { %s4054_s19 = scalar_lea.vmem [#allocation11], %s2367_s9  ;;  %p4513_p9 = scmp.ne.s32.totalorder %s4493_s10, 0 }
  0xe9   : > { %3680 = dma.done.wait (%p4513_p9), %s354_s20, 16640  }
  0xea   : > { %3682 = vsyncadd (%p4513_p9), %s354_s20, 4294950656  ;;  %v3712_v0 = vmov 0.0|0.0   ;;  %vm3713_vm0 = vmmov 0   ;;  %v3714_v1 = vmov 0.0   ;;  %v406_v2 = vld [vmem:[#allocation5] sm:$0xff]  ;;  %v407_v3 = vld [vmem:[#allocation5 + $0x8] sm:$0xff] }
  0xeb   : > { %3033 = vmatprep.subr.bf16.mxu0 %v3712_v0  ;;  %2707 = vmatprep.mubr.msk.f32.mxu0 %vm3713_vm0, %v3714_v1  ;;  %v408_v4 = vld [vmem:[#allocation5 + $0x10] sm:$0xff]  ;;  %v3034_v5 = vpack.c.bf16 %v407_v3, %v406_v2  ;;  %v409_v6 = vld [vmem:[#allocation5 + $0x18] sm:$0xff]  ;;  %v410_v11 = vld [vmem:[#allocation5 + $0x20] sm:$0xff]  ;;  %vm419_vm1 = vcmask 392192   ;;  %vm509_vm2 = vcmask 523264   ;;  %s2368_s10 = sshll.u32 %s4051_s8, 4 }
  0xec   : > { %3042 = vmatprep.subr.bf16.mxu1 %v3712_v0  ;;  %2726 = vmatprep.mubr.msk.f32.mxu1 %vm3713_vm0, %v3714_v1  ;;  %v494_v7 = vld [vmem:[#allocation8] sm:$0xff]  ;;  %v495_v8 = vld [vmem:[#allocation8 + $0x8] sm:$0xff]  ;;  %v3037_v9 = vpack.c.bf16 %v409_v6, %v408_v4  ;;  %v411_v12 = vld [vmem:[#allocation5 + $0x28] sm:$0xff]  ;;  %s4333_s23 = scalar_lea.vmem [#allocation13], %s2368_s10  ;;  %vm677_vm3 = vcmask 519168   ;;  %vm687_vm4 = vcmask 516096  }
  0xed   : > { %3035 = vmatpush3.bf16.msra.mxu0 %v3034_v5  ;;  %v3043_v10 = vpack.c.bf16 %v495_v8, %v494_v7  ;;  %v3040_v13 = vpack.c.bf16 %v411_v12, %v410_v11  ;;  %v405_v14 = vld [vmem:[#allocation2] sm:$0xf]  ;;  %v496_v15 = vld [vmem:[#allocation8 + $0x10] sm:$0xff]  ;;  %v497_v16 = vld [vmem:[#allocation8 + $0x18] sm:$0xff]  ;;  %s4347_s29 = scalar_lea.vmem [#allocation14], %s2368_s10  ;;  %s2534_s22 = sshll.u32 %s3779_s30, 8 }
  0xee   : > { %3036 = vmatprep.subr.bf16.mxu0 %v3712_v0  ;;  %v3046_v17 = vpack.c.bf16 %v497_v16, %v496_v15  ;;  %v498_v18 = vld [vmem:[#allocation8 + $0x20] sm:$0xff]  ;;  %v499_v19 = vld [vmem:[#allocation8 + $0x28] sm:$0xff]  ;;  %v500_v21 = vld [vmem:[#allocation8 + $0x30] sm:$0xff]  ;;  %s2203_s5 = sshll.u32 %s4347_s29, 4  ;;  %s4404_s28 = scalar_lea.hbm %s4460_s7, %s2534_s22  ;;  %s4406_s5 = int_to_ptr.vmem [resolvable:$true] %s2203_s5 }
  0xef   : > { %3044 = vmatpush3.bf16.msra.mxu1 %v3043_v10  ;;  %v3049_v20 = vpack.c.bf16 %v499_v19, %v498_v18  ;;  %v501_v22 = vld [vmem:[#allocation8 + $0x38] sm:$0xff]  ;;  %v584_v24 = vld [vmem:[%s4054_s19] sm:$0xff]  ;;  %v585_v25 = vld [vmem:[%s4054_s19 + $0x8] sm:$0xff]  ;;  %s2190_s30 = scalar_lea.sflag [#allocation4], %s4051_s8  ;;  %s3623_s17 = scalar_lea.vmem %s4406_s5, 256 }
  0xf0   : > { %3045 = vmatprep.subr.bf16.mxu1 %v3712_v0  ;;  %v3052_v23 = vpack.c.bf16 %v501_v22, %v500_v21  ;;  %v3055_v26 = vpack.c.bf16 %v585_v25, %v584_v24  ;;  %v2370_v27 = vld [vmem:[#allocation7] ss:$0 sm:$0xff]  ;;  %v2376_v31 = vld [vmem:[%s4054_s19 + $0x40] sm:$0xff]  ;;  %v2377_v32 = vld [vmem:[%s4054_s19 + $0x48] sm:$0xff]  ;;  %p3624_p1 = scmp.ne.s32.totalorder %s4406_s5, %s3623_s17  ;;  %p4514_p7 = scmp.ne.s32.totalorder %s4494_s16, 0 }
  0xf1   : > { %3038 = vmatpush3.bf16.msra.mxu0 %v3037_v9  ;;  %v3067_v33 = vpack.c.bf16 %v2377_v32, %v2376_v31  ;;  %v586_v35 = vld [vmem:[%s4054_s19 + $0x10] sm:$0xff]  ;;  %v587_v36 = vld [vmem:[%s4054_s19 + $0x18] sm:$0xff]  ;;  %v588_v41 = vld [vmem:[%s4054_s19 + $0x20] sm:$0xff]  ;;  %s3715_s18 = smov [#allocation14]  }
  0xf2   : > { %3039 = vmatprep.subr.bf16.mxu0 %v3712_v0  ;;  %v2378_v37 = vld [vmem:[%s4054_s19 + $0x50] sm:$0xff]  ;;  %v3058_v38 = vpack.c.bf16 %v587_v36, %v586_v35  ;;  %v2379_v39 = vld [vmem:[%s4054_s19 + $0x58] sm:$0xff]  ;;  %v589_v42 = vld [vmem:[%s4054_s19 + $0x28] sm:$0xff]  ;;  %p3625_p5 = pnand %p3624_p1, %p4514_p7  ;;  %s3627_s11 = sshll.u32 %s3715_s18, 4  ;;  %s3628_s11 = int_to_ptr.vmem [resolvable:$false] %s3627_s11 }
  0xf3   : > { %3047 = vmatpush3.bf16.msra.mxu1 %v3046_v17  ;;  %v3070_v40 = vpack.c.bf16 %v2379_v39, %v2378_v37  ;;  %v2380_v43 = vld [vmem:[%s4054_s19 + $0x60] sm:$0xff]  ;;  %v3061_v44 = vpack.c.bf16 %v589_v42, %v588_v41  ;;  %v2381_v45 = vld [vmem:[%s4054_s19 + $0x68] sm:$0xff]  ;;  %v590_v46 = vld [vmem:[%s4054_s19 + $0x30] sm:$0xff]  ;;  %s3629_s12 = scalar_lea.vmem %s3628_s11, 512  ;;  %p3630_p0 = scmp.lt.s32.totalorder %s4406_s5, %s3628_s11 }
  0xf4   : > { %3048 = vmatprep.subr.bf16.mxu1 %v3712_v0  ;;  %v591_v47 = vld [vmem:[%s4054_s19 + $0x38] sm:$0xff]  ;;  %v3073_v48 = vpack.c.bf16 %v2381_v45, %v2380_v43  ;;  %v2382_v49 = vld [vmem:[%s4054_s19 + $0x70] sm:$0xff]  ;;  %v2386_v57 = vld [vmem:[%s4054_s19 + $0x80] sm:$0xff]  ;;  %p3626_p4 = pneg %p3625_p5  ;;  %p3631_p11 = scmp.lt.s32.totalorder %s3629_s12, %s3623_s17 }
  0xf5   : > { %3041 = vmatpush3.bf16.msra.mxu0 %v3040_v13  ;;  %v2383_v50 = vld [vmem:[%s4054_s19 + $0x78] sm:$0xff]  ;;  %v3064_v51 = vpack.c.bf16 %v591_v47, %v590_v46  ;;  %v2387_v58 = vld [vmem:[%s4054_s19 + $0x88] sm:$0xff]  ;;  %v2396_v59 = vld [vmem:[%s4054_s19 + $0xc0] sm:$0xff] }
  0xf6   : > { %3054 = vmatprep.subr.bf16.mxu0 %v3712_v0  ;;  %v3076_v52 = vpack.c.bf16 %v2383_v50, %v2382_v49  ;;  %v2372_v53 = vld [vmem:[#allocation10] ss:$0 sm:$0xff]  ;;  %v2397_v60 = vld [vmem:[%s4054_s19 + $0xc8] sm:$0xff]  ;;  %v3079_v61 = vpack.c.bf16 %v2387_v58, %v2386_v57  ;;  %v2388_v63 = vld [vmem:[%s4054_s19 + $0x90] sm:$0xff]  ;;  %p3632_p10 = por %p3631_p11, %p3630_p0 }
  0xf7   : > { %3050 = vmatpush3.bf16.msra.mxu1 %v3049_v20  ;;  %v3091_v62 = vpack.c.bf16 %v2397_v60, %v2396_v59  ;;  %v2389_v2 = vld [vmem:[%s4054_s19 + $0x98] sm:$0xff]  ;;  %v2398_v3 = vld [vmem:[%s4054_s19 + $0xd0] sm:$0xff]  ;;  %v2390_v8 = vld [vmem:[%s4054_s19 + $0xa0] sm:$0xff] }
  0xf8   : > { %2708 = vmatmul.mubr.msk.f32.vlgmr.msra.gmra.mrb[0].mxu0 %vm419_vm1, %v405_v14  ;;  %3051 = vmatprep.subr.bf16.mxu1 %v3712_v0  ;;  %v2399_v4 = vld [vmem:[%s4054_s19 + $0xd8] sm:$0xff]  ;;  %v3082_v6 = vpack.c.bf16 %v2389_v2, %v2388_v63  ;;  %v2391_v9 = vld [vmem:[%s4054_s19 + $0xa8] sm:$0xff]  ;;  %v2400_v10 = vld [vmem:[%s4054_s19 + $0xe0] sm:$0xff]  ;;  %p3633_p8 = pnand %p3632_p10, %p3626_p4 }
  0xf9   : > { %2745 = vmatprep.mubr.msk.f32.mxu0 %vm3713_vm0, %v3714_v1  ;;  %3056 = vmatpush3.bf16.msra.mxu0 %v3055_v26  ;;  %v3094_v7 = vpack.c.bf16 %v2399_v4, %v2398_v3  ;;  %v2401_v11 = vld [vmem:[%s4054_s19 + $0xe8] sm:$0xff]  ;;  %v3085_v12 = vpack.c.bf16 %v2391_v9, %v2390_v8  ;;  %v2392_v14 = vld [vmem:[%s4054_s19 + $0xb0] sm:$0xff]  ;;  %v2393_v15 = vld [vmem:[%s4054_s19 + $0xb8] sm:$0xff] }
  0xfa   : > { %3057 = vmatprep.subr.bf16.mxu0 %v3712_v0  ;;  %v3097_v13 = vpack.c.bf16 %v2401_v11, %v2400_v10  ;;  %v2402_v16 = vld [vmem:[%s4054_s19 + $0xf0] sm:$0xff]  ;;  %v2403_v17 = vld [vmem:[%s4054_s19 + $0xf8] sm:$0xff]  ;;  %v3088_v18 = vpack.c.bf16 %v2393_v15, %v2392_v14  ;;  %v2406_v20 = vld [vmem:[%s4054_s19 + $0x100] sm:$0xff] }
  0xfb   : > { %3053 = vmatpush3.bf16.msra.mxu1 %v3052_v23  ;;  %v3100_v19 = vpack.c.bf16 %v2403_v17, %v2402_v16  ;;  %v2407_v21 = vld [vmem:[%s4054_s19 + $0x108] sm:$0xff]  ;;  %v2416_v22 = vld [vmem:[%s4054_s19 + $0x140] sm:$0xff]  ;;  %v2408_v26 = vld [vmem:[%s4054_s19 + $0x110] sm:$0xff] }
  0xfc   : > { %3066 = vmatprep.subr.bf16.mxu1 %v3712_v0  ;;  %v2417_v23 = vld [vmem:[%s4054_s19 + $0x148] sm:$0xff]  ;;  %v3103_v24 = vpack.c.bf16 %v2407_v21, %v2406_v20  ;;  %v2410_v32 = vld [vmem:[%s4054_s19 + $0x120] sm:$0xff]  ;;  %v2413_v39 = vld [vmem:[%s4054_s19 + $0x138] sm:$0xff] }
  0xfd   : > { %3059 = vmatpush3.bf16.msra.mxu0 %v3058_v38  ;;  %v3115_v25 = vpack.c.bf16 %v2417_v23, %v2416_v22  ;;  %v2421_v35 = vld [vmem:[%s4054_s19 + $0x168] sm:$0xff]  ;;  %v2412_v38 = vld [vmem:[%s4054_s19 + $0x130] sm:$0xff]  ;;  %v2423_v41 = vld [vmem:[%s4054_s19 + $0x178] sm:$0xff] }
  0xfe   : > { %3060 = vmatprep.subr.bf16.mxu0 %v3712_v0  ;;  %v3112_v42 = vpack.c.bf16 %v2413_v39, %v2412_v38  ;;  %v2427_v45 = vld [vmem:[%s4054_s19 + $0x188] sm:$0xff]  ;;  %v2436_v46 = vld [vmem:[%s4054_s19 + $0x1c0] sm:$0xff]  ;;  %v2428_v50 = vld [vmem:[%s4054_s19 + $0x190] sm:$0xff] }
  0xff   : > { %v2437_v47 = vld [vmem:[%s4054_s19 + $0x1c8] sm:$0xff]  ;;  %v2440_v58 = vld [vmem:[%s4054_s19 + $0x1e0] sm:$0xff]  ;;  %v2433_v63 = vld [vmem:[%s4054_s19 + $0x1b8] sm:$0xff] }
 0x100   : > { %v3139_v49 = vpack.c.bf16 %v2437_v47, %v2436_v46  ;;  %v2431_v57 = vld [vmem:[%s4054_s19 + $0x1a8] sm:$0xff]  ;;  %v2442_v2 = vld [vmem:[%s4054_s19 + $0x1f0] sm:$0xff]  ;;  %v2443_v3 = vld [vmem:[%s4054_s19 + $0x1f8] sm:$0xff] }
 0x101   : > { %3062 = vmatpush3.bf16.msra.mxu0 %v3061_v44  ;;  %v2426_v44 = vld [vmem:[%s4054_s19 + $0x180] sm:$0xff]  ;;  %v2441_v59 = vld [vmem:[%s4054_s19 + $0x1e8] sm:$0xff]  ;;  %v2449_v14 = vld [vmem:[%s4054_s19 + $0x218] sm:$0xff] }
 0x102   : > { %3063 = vmatprep.subr.bf16.mxu0 %v3712_v0  ;;  %v2447_v8 = vld [vmem:[%s4054_s19 + $0x208] sm:$0xff]  ;;  %v2456_v9 = vld [vmem:[%s4054_s19 + $0x240] sm:$0xff]  ;;  %v2458_v15 = vld [vmem:[%s4054_s19 + $0x250] sm:$0xff] }
 0x103   : > { %v2457_v10 = vld [vmem:[%s4054_s19 + $0x248] sm:$0xff]  ;;  %v2459_v16 = vld [vmem:[%s4054_s19 + $0x258] sm:$0xff]  ;;  %v2460_v21 = vld [vmem:[%s4054_s19 + $0x260] sm:$0xff] }
 0x104   : > { %v2451_v20 = vld [vmem:[%s4054_s19 + $0x228] sm:$0xff]  ;;  %v2469_v38 = vld [vmem:[%s4054_s19 + $0x298] sm:$0xff]  ;;  %v2478_v39 = vld [vmem:[%s4054_s19 + $0x2d0] sm:$0xff] }
 0x105   : > { %3065 = vmatpush3.bf16.msra.mxu0 %v3064_v51  ;;  %v2429_v51 = vld [vmem:[%s4054_s19 + $0x198] sm:$0xff]  ;;  %v2461_v22 = vld [vmem:[%s4054_s19 + $0x268] sm:$0xff] }
 0x106   : > { %3078 = vmatprep.subr.bf16.mxu0 %v3712_v0  ;;  %v2481_v46 = vld [vmem:[%s4054_s19 + $0x2e8] sm:$0xff] }
 0x1cb   : > { %v489_v28 = vpop.f32.mrb[0].mxu0 }
 0x1cc   : > { %v490_v29 = vadd.f32 %v2370_v27, %v489_v28  ;;  %v2709_v30 = vpop.f32.mrb[1].mxu0  ;;  %v2409_v27 = vld [vmem:[%s4054_s19 + $0x118] sm:$0xff]  ;;  %v2418_v28 = vld [vmem:[%s4054_s19 + $0x150] sm:$0xff] }
 0x1cd   : > { %v3106_v30 = vpack.c.bf16 %v2409_v27, %v2408_v26  ;;  %v2453_v26 = vld [vmem:[%s4054_s19 + $0x238] sm:$0xff]  ;;  %v2462_v27 = vld [vmem:[%s4054_s19 + $0x270] sm:$0xff] }
 0x1ce   : > { %3355 = vtanh.f32 %v490_v29  ;;  %v2419_v29 = vld [vmem:[%s4054_s19 + $0x158] sm:$0xff] }
 0x1cf   : > { %v3118_v31 = vpack.c.bf16 %v2419_v29, %v2418_v28  ;;  %v2463_v28 = vld [vmem:[%s4054_s19 + $0x278] sm:$0xff] }
 0x1d8   : > { %v3356_v34 = vpop.eup %3355 }
 0x1d9   : > { %2727 = vmatmul.mubr.msk.f32.vlgmr.msra.gmra.mrb[0].mxu1 %vm509_vm2, %v3356_v34  ;;  %v2420_v34 = vld [vmem:[%s4054_s19 + $0x160] sm:$0xff] }
 0x1da   : > { %3068 = vmatpush3.bf16.msra.mxu1 %v3067_v33  ;;  %2764 = vmatprep.mubr.msk.f32.mxu1 %vm3713_vm0, %v3714_v1  ;;  %v2411_v33 = vld [vmem:[%s4054_s19 + $0x128] sm:$0xff]  ;;  %v3121_v37 = vpack.c.bf16 %v2421_v35, %v2420_v34 }
 0x1db   : > { %3069 = vmatprep.subr.bf16.mxu1 %v3712_v0  ;;  %v3109_v36 = vpack.c.bf16 %v2411_v33, %v2410_v32  ;;  %v2467_v32 = vld [vmem:[%s4054_s19 + $0x288] sm:$0xff]  ;;  %v2476_v33 = vld [vmem:[%s4054_s19 + $0x2c0] sm:$0xff] }
 0x1dc   : > { %v2477_v34 = vld [vmem:[%s4054_s19 + $0x2c8] sm:$0xff] }
 0x1de   : > { %3071 = vmatpush3.bf16.msra.mxu1 %v3070_v40  ;;  %v2422_v40 = vld [vmem:[%s4054_s19 + $0x170] sm:$0xff] }
 0x1df   : > { %3072 = vmatprep.subr.bf16.mxu1 %v3712_v0  ;;  %v3124_v43 = vpack.c.bf16 %v2423_v41, %v2422_v40  ;;  %v2479_v40 = vld [vmem:[%s4054_s19 + $0x2d8] sm:$0xff] }
 0x1e2   : > { %3074 = vmatpush3.bf16.msra.mxu1 %v3073_v48  ;;  %v3127_v48 = vpack.c.bf16 %v2427_v45, %v2426_v44  ;;  %v2471_v44 = vld [vmem:[%s4054_s19 + $0x2a8] sm:$0xff]  ;;  %v2480_v45 = vld [vmem:[%s4054_s19 + $0x2e0] sm:$0xff] }
 0x1e3   : > { %3075 = vmatprep.subr.bf16.mxu1 %v3712_v0 }
 0x1e6   : > { %3077 = vmatpush3.bf16.msra.mxu1 %v3076_v52  ;;  %v2438_v52 = vld [vmem:[%s4054_s19 + $0x1d0] sm:$0xff] }
 0x1e7   : > { %3090 = vmatprep.subr.bf16.mxu1 %v3712_v0 }
 0x2ac   : > { %v579_v54 = vpop.f32.mrb[0].mxu1 }
 0x2ad   : > { %v580_v55 = vadd.f32 %v2372_v53, %v579_v54  ;;  %v2728_v56 = vpop.f32.mrb[1].mxu1  ;;  %v2439_v53 = vld [vmem:[%s4054_s19 + $0x1d8] sm:$0xff]  ;;  %v3130_v54 = vpack.c.bf16 %v2429_v51, %v2428_v50  ;;  %v2482_v51 = vld [vmem:[%s4054_s19 + $0x2f0] sm:$0xff] }
 0x2ae   : > { %v2430_v56 = vld [vmem:[%s4054_s19 + $0x1a0] sm:$0xff]  ;;  %v2473_v50 = vld [vmem:[%s4054_s19 + $0x2b8] sm:$0xff] }
 0x2af   : > { %3357 = vtanh.f32 %v580_v55  ;;  %v3142_v55 = vpack.c.bf16 %v2439_v53, %v2438_v52  ;;  %v3133_v60 = vpack.c.bf16 %v2431_v57, %v2430_v56  ;;  %v2483_v52 = vld [vmem:[%s4054_s19 + $0x2f8] sm:$0xff]  ;;  %v2487_v56 = vld [vmem:[%s4054_s19 + $0x308] sm:$0xff]  ;;  %v2496_v57 = vld [vmem:[%s4054_s19 + $0x340] sm:$0xff] }
 0x2b9   : > { %v4110_v5 = vpop.eup %3357 }
 0x2ba   : > { %2746 = vmatmul.mubr.msk.f32.vlgmr.msra.gmra.mrb[2].mxu0 %vm509_vm2, %v4110_v5  ;;  %2765 = vmatmul.mubr.msk.f32.vlgmr.msra.gmra.mrb[2].mxu1 %vm509_vm2, %v4110_v5 }
 0x2bb   : > { %3080 = vmatpush3.bf16.msra.mxu0 %v3079_v61  ;;  %3092 = vmatpush3.bf16.msra.mxu1 %v3091_v62  ;;  %v3145_v61 = vpack.c.bf16 %v2441_v59, %v2440_v58  ;;  %v2432_v62 = vld [vmem:[%s4054_s19 + $0x1b0] sm:$0xff]  ;;  %v2497_v58 = vld [vmem:[%s4054_s19 + $0x348] sm:$0xff] }
 0x2bc   : > { %3081 = vmatprep.subr.bf16.mxu0 %v3712_v0  ;;  %3093 = vmatprep.subr.bf16.mxu1 %v3712_v0  ;;  %v3136_v4 = vpack.c.bf16 %v2433_v63, %v2432_v62  ;;  %v2489_v62 = vld [vmem:[%s4054_s19 + $0x318] sm:$0xff]  ;;  %v2498_v63 = vld [vmem:[%s4054_s19 + $0x350] sm:$0xff] }
 0x2bd   : > { %2783 = vmatprep.mubr.msk.f32.mxu0 %vm3713_vm0, %v3714_v1  ;;  %2802 = vmatprep.mubr.msk.f32.mxu1 %vm3713_vm0, %v3714_v1 }
 0x2bf   : > { %3083 = vmatpush3.bf16.msra.mxu0 %v3082_v6  ;;  %3095 = vmatpush3.bf16.msra.mxu1 %v3094_v7  ;;  %v3148_v6 = vpack.c.bf16 %v2443_v3, %v2442_v2  ;;  %v2446_v7 = vld [vmem:[%s4054_s19 + $0x200] sm:$0xff]  ;;  %v2499_v2 = vld [vmem:[%s4054_s19 + $0x358] sm:$0xff] }
 0x2c0   : > { %3084 = vmatprep.subr.bf16.mxu0 %v3712_v0  ;;  %3096 = vmatprep.subr.bf16.mxu1 %v3712_v0  ;;  %v3151_v11 = vpack.c.bf16 %v2447_v8, %v2446_v7  ;;  %v2491_v7 = vld [vmem:[%s4054_s19 + $0x328] sm:$0xff]  ;;  %v2500_v8 = vld [vmem:[%s4054_s19 + $0x360] sm:$0xff] }
 0x2c3   : > { %3086 = vmatpush3.bf16.msra.mxu0 %v3085_v12  ;;  %3098 = vmatpush3.bf16.msra.mxu1 %v3097_v13  ;;  %v3163_v12 = vpack.c.bf16 %v2457_v10, %v2456_v9  ;;  %v2448_v13 = vld [vmem:[%s4054_s19 + $0x210] sm:$0xff]  ;;  %v2501_v9 = vld [vmem:[%s4054_s19 + $0x368] sm:$0xff] }
 0x2c4   : > { %3087 = vmatprep.subr.bf16.mxu0 %v3712_v0  ;;  %3099 = vmatprep.subr.bf16.mxu1 %v3712_v0  ;;  %v3154_v17 = vpack.c.bf16 %v2449_v14, %v2448_v13  ;;  %v2493_v13 = vld [vmem:[%s4054_s19 + $0x338] sm:$0xff]  ;;  %v2502_v14 = vld [vmem:[%s4054_s19 + $0x370] sm:$0xff] }
 0x2c7   : > { %3089 = vmatpush3.bf16.msra.mxu0 %v3088_v18  ;;  %3101 = vmatpush3.bf16.msra.mxu1 %v3100_v19  ;;  %v3166_v18 = vpack.c.bf16 %v2459_v16, %v2458_v15  ;;  %v2450_v19 = vld [vmem:[%s4054_s19 + $0x220] sm:$0xff]  ;;  %v2503_v15 = vld [vmem:[%s4054_s19 + $0x378] sm:$0xff] }
 0x2c8   : > { %3102 = vmatprep.subr.bf16.mxu0 %v3712_v0  ;;  %3114 = vmatprep.subr.bf16.mxu1 %v3712_v0  ;;  %v3157_v23 = vpack.c.bf16 %v2451_v20, %v2450_v19  ;;  %v2507_v19 = vld [vmem:[%s4054_s19 + $0x388] sm:$0xff]  ;;  %v2516_v20 = vld [vmem:[%s4054_s19 + $0x3c0] sm:$0xff] }
 0x2ca   : > { %2784 = vmatmul.mubr.msk.f32.vlgmr.msra.gmra.mrb[4].mxu0 %vm509_vm2, %v4110_v5  ;;  %2803 = vmatmul.mubr.msk.f32.vlgmr.msra.gmra.mrb[4].mxu1 %vm509_vm2, %v4110_v5 }
 0x2cb   : > { %3104 = vmatpush3.bf16.msra.mxu0 %v3103_v24  ;;  %3116 = vmatpush3.bf16.msra.mxu1 %v3115_v25  ;;  %v3169_v24 = vpack.c.bf16 %v2461_v22, %v2460_v21  ;;  %v2452_v25 = vld [vmem:[%s4054_s19 + $0x230] sm:$0xff]  ;;  %v2517_v21 = vld [vmem:[%s4054_s19 + $0x3c8] sm:$0xff] }
 0x2cc   : > { %3105 = vmatprep.subr.bf16.mxu0 %v3712_v0  ;;  %3117 = vmatprep.subr.bf16.mxu1 %v3712_v0  ;;  %v3160_v29 = vpack.c.bf16 %v2453_v26, %v2452_v25  ;;  %v2509_v25 = vld [vmem:[%s4054_s19 + $0x398] sm:$0xff]  ;;  %v2518_v26 = vld [vmem:[%s4054_s19 + $0x3d0] sm:$0xff] }
 0x2cd   : > { %2821 = vmatprep.mubr.msk.f32.mxu0 %vm3713_vm0, %v3714_v1  ;;  %2840 = vmatprep.mubr.msk.f32.mxu1 %vm3713_vm0, %v3714_v1 }
 0x2cf   : > { %3107 = vmatpush3.bf16.msra.mxu0 %v3106_v30  ;;  %3119 = vmatpush3.bf16.msra.mxu1 %v3118_v31  ;;  %v3172_v30 = vpack.c.bf16 %v2463_v28, %v2462_v27  ;;  %v2466_v31 = vld [vmem:[%s4054_s19 + $0x280] sm:$0xff]  ;;  %v2519_v27 = vld [vmem:[%s4054_s19 + $0x3d8] sm:$0xff] }
 0x2d0   : > { %3108 = vmatprep.subr.bf16.mxu0 %v3712_v0  ;;  %3120 = vmatprep.subr.bf16.mxu1 %v3712_v0  ;;  %v3175_v35 = vpack.c.bf16 %v2467_v32, %v2466_v31  ;;  %v2511_v31 = vld [vmem:[%s4054_s19 + $0x3a8] sm:$0xff]  ;;  %v2520_v32 = vld [vmem:[%s4054_s19 + $0x3e0] sm:$0xff] }
 0x2d3   : > { %3110 = vmatpush3.bf16.msra.mxu0 %v3109_v36  ;;  %3122 = vmatpush3.bf16.msra.mxu1 %v3121_v37  ;;  %v3187_v36 = vpack.c.bf16 %v2477_v34, %v2476_v33  ;;  %v2468_v37 = vld [vmem:[%s4054_s19 + $0x290] sm:$0xff]  ;;  %v2521_v33 = vld [vmem:[%s4054_s19 + $0x3e8] sm:$0xff] }
 0x2d4   : > { %3111 = vmatprep.subr.bf16.mxu0 %v3712_v0  ;;  %3123 = vmatprep.subr.bf16.mxu1 %v3712_v0  ;;  %v3178_v41 = vpack.c.bf16 %v2469_v38, %v2468_v37  ;;  %v2513_v37 = vld [vmem:[%s4054_s19 + $0x3b8] sm:$0xff]  ;;  %v2522_v38 = vld [vmem:[%s4054_s19 + $0x3f0] sm:$0xff] }
 0x2d7   : > { %3113 = vmatpush3.bf16.msra.mxu0 %v3112_v42  ;;  %3125 = vmatpush3.bf16.msra.mxu1 %v3124_v43  ;;  %v3190_v42 = vpack.c.bf16 %v2479_v40, %v2478_v39  ;;  %v2470_v43 = vld [vmem:[%s4054_s19 + $0x2a0] sm:$0xff]  ;;  %v2523_v39 = vld [vmem:[%s4054_s19 + $0x3f8] sm:$0xff] }
 0x2d8   : > { %3126 = vmatprep.subr.bf16.mxu0 %v3712_v0  ;;  %3138 = vmatprep.subr.bf16.mxu1 %v3712_v0  ;;  %v3181_v47 = vpack.c.bf16 %v2471_v44, %v2470_v43 }
 0x2da   : > { %2822 = vmatmul.mubr.msk.f32.vlgmr.msra.gmra.mrb[6].mxu0 %vm509_vm2, %v4110_v5  ;;  %2841 = vmatmul.mubr.msk.f32.vlgmr.msra.gmra.mrb[6].mxu1 %vm509_vm2, %v4110_v5 }
 0x2db   : > { %3128 = vmatpush3.bf16.msra.mxu0 %v3127_v48  ;;  %3140 = vmatpush3.bf16.msra.mxu1 %v3139_v49  ;;  %v3193_v48 = vpack.c.bf16 %v2481_v46, %v2480_v45  ;;  %v2472_v49 = vld [vmem:[%s4054_s19 + $0x2b0] sm:$0xff] }
 0x2dc   : > { %3129 = vmatprep.subr.bf16.mxu0 %v3712_v0  ;;  %3141 = vmatprep.subr.bf16.mxu1 %v3712_v0  ;;  %v3184_v53 = vpack.c.bf16 %v2473_v50, %v2472_v49 }
 0x2dd   : > { %2859 = vmatprep.mubr.msk.f32.mxu0 %vm3713_vm0, %v3714_v1  ;;  %2878 = vmatprep.mubr.msk.f32.mxu1 %vm3713_vm0, %v3714_v1 }
 0x2df   : > { %3131 = vmatpush3.bf16.msra.mxu0 %v3130_v54  ;;  %3143 = vmatpush3.bf16.msra.mxu1 %v3142_v55  ;;  %v3196_v54 = vpack.c.bf16 %v2483_v52, %v2482_v51  ;;  %v2486_v55 = vld [vmem:[%s4054_s19 + $0x300] sm:$0xff] }
 0x2e0   : > { %3132 = vmatprep.subr.bf16.mxu0 %v3712_v0  ;;  %3144 = vmatprep.subr.bf16.mxu1 %v3712_v0  ;;  %v3199_v59 = vpack.c.bf16 %v2487_v56, %v2486_v55  ;;  %v2394_v51 = vld [vmem:[%s4333_s23 + $0x2] ss:$0 sm:$0xff]  ;;  %v2404_v52 = vld [vmem:[%s4333_s23 + $0x3] ss:$0 sm:$0xff] }
 0x2e3   : > { %3134 = vmatpush3.bf16.msra.mxu0 %v3133_v60  ;;  %3146 = vmatpush3.bf16.msra.mxu1 %v3145_v61  ;;  %v3211_v60 = vpack.c.bf16 %v2497_v58, %v2496_v57  ;;  %v2488_v61 = vld [vmem:[%s4054_s19 + $0x310] sm:$0xff] }
 0x2e4   : > { %3135 = vmatprep.subr.bf16.mxu0 %v3712_v0  ;;  %3147 = vmatprep.subr.bf16.mxu1 %v3712_v0  ;;  %v3202_v3 = vpack.c.bf16 %v2489_v62, %v2488_v61 }
 0x2e7   : > { %3137 = vmatpush3.bf16.msra.mxu0 %v3136_v4  ;;  %3149 = vmatpush3.bf16.msra.mxu1 %v3148_v6  ;;  %v3214_v4 = vpack.c.bf16 %v2499_v2, %v2498_v63  ;;  %v2490_v6 = vld [vmem:[%s4054_s19 + $0x320] sm:$0xff] }
 0x2e8   : > { %3150 = vmatprep.subr.bf16.mxu0 %v3712_v0  ;;  %3162 = vmatprep.subr.bf16.mxu1 %v3712_v0  ;;  %v3205_v10 = vpack.c.bf16 %v2491_v7, %v2490_v6  ;;  %v2414_v7 = vld [vmem:[%s4333_s23 + $0x4] ss:$0 sm:$0xff] }
 0x2ea   : > { %2860 = vmatmul.mubr.msk.f32.vlgmr.msra.gmra.mrb[8].mxu0 %vm509_vm2, %v4110_v5  ;;  %2879 = vmatmul.mubr.msk.f32.vlgmr.msra.gmra.mrb[8].mxu1 %vm509_vm2, %v4110_v5 }
 0x2eb   : > { %3152 = vmatpush3.bf16.msra.mxu0 %v3151_v11  ;;  %3164 = vmatpush3.bf16.msra.mxu1 %v3163_v12  ;;  %v3217_v11 = vpack.c.bf16 %v2501_v9, %v2500_v8  ;;  %v2492_v12 = vld [vmem:[%s4054_s19 + $0x330] sm:$0xff] }
 0x2ec   : > { %3153 = vmatprep.subr.bf16.mxu0 %v3712_v0  ;;  %3165 = vmatprep.subr.bf16.mxu1 %v3712_v0  ;;  %v3208_v16 = vpack.c.bf16 %v2493_v13, %v2492_v12  ;;  %v2424_v8 = vld [vmem:[%s4333_s23 + $0x5] ss:$0 sm:$0xff] }
 0x2ed   : > { %2897 = vmatprep.mubr.msk.f32.mxu0 %vm3713_vm0, %v3714_v1  ;;  %2916 = vmatprep.mubr.msk.f32.mxu1 %vm3713_vm0, %v3714_v1 }
 0x2ef   : > { %3155 = vmatpush3.bf16.msra.mxu0 %v3154_v17  ;;  %3167 = vmatpush3.bf16.msra.mxu1 %v3166_v18  ;;  %v3220_v17 = vpack.c.bf16 %v2503_v15, %v2502_v14  ;;  %v2506_v18 = vld [vmem:[%s4054_s19 + $0x380] sm:$0xff] }
 0x2f0   : > { %3156 = vmatprep.subr.bf16.mxu0 %v3712_v0  ;;  %3168 = vmatprep.subr.bf16.mxu1 %v3712_v0  ;;  %v3223_v22 = vpack.c.bf16 %v2507_v19, %v2506_v18 }
 0x2f3   : > { %3158 = vmatpush3.bf16.msra.mxu0 %v3157_v23  ;;  %3170 = vmatpush3.bf16.msra.mxu1 %v3169_v24  ;;  %v3235_v23 = vpack.c.bf16 %v2517_v21, %v2516_v20  ;;  %v2508_v24 = vld [vmem:[%s4054_s19 + $0x390] sm:$0xff] }
 0x2f4   : > { %3159 = vmatprep.subr.bf16.mxu0 %v3712_v0  ;;  %3171 = vmatprep.subr.bf16.mxu1 %v3712_v0  ;;  %v3226_v28 = vpack.c.bf16 %v2509_v25, %v2508_v24 }
 0x2f7   : > { %3161 = vmatpush3.bf16.msra.mxu0 %v3160_v29  ;;  %3173 = vmatpush3.bf16.msra.mxu1 %v3172_v30  ;;  %v3238_v29 = vpack.c.bf16 %v2519_v27, %v2518_v26  ;;  %v2510_v30 = vld [vmem:[%s4054_s19 + $0x3a0] sm:$0xff] }
 0x2f8   : > { %3174 = vmatprep.subr.bf16.mxu0 %v3712_v0  ;;  %3186 = vmatprep.subr.bf16.mxu1 %v3712_v0  ;;  %v3229_v34 = vpack.c.bf16 %v2511_v31, %v2510_v30 }
 0x2fa   : > { %2898 = vmatmul.mubr.msk.f32.vlgmr.msra.gmra.mrb[10].mxu0 %vm509_vm2, %v4110_v5  ;;  %2917 = vmatmul.mubr.msk.f32.vlgmr.msra.gmra.mrb[10].mxu1 %vm509_vm2, %v4110_v5 }
 0x2fb   : > { %3176 = vmatpush3.bf16.msra.mxu0 %v3175_v35  ;;  %3188 = vmatpush3.bf16.msra.mxu1 %v3187_v36  ;;  %v3241_v35 = vpack.c.bf16 %v2521_v33, %v2520_v32  ;;  %v2512_v36 = vld [vmem:[%s4054_s19 + $0x3b0] sm:$0xff] }
 0x2fc   : > { %3177 = vmatprep.subr.bf16.mxu0 %v3712_v0  ;;  %3189 = vmatprep.subr.bf16.mxu1 %v3712_v0  ;;  %v3232_v40 = vpack.c.bf16 %v2513_v37, %v2512_v36 }
 0x2fd   : > { %2935 = vmatprep.mubr.msk.f32.mxu0 %vm3713_vm0, %v3714_v1  ;;  %2954 = vmatprep.mubr.msk.f32.mxu1 %vm3713_vm0, %v3714_v1 }
 0x2ff   : > { %3179 = vmatpush3.bf16.msra.mxu0 %v3178_v41  ;;  %3191 = vmatpush3.bf16.msra.mxu1 %v3190_v42  ;;  %v3244_v41 = vpack.c.bf16 %v2523_v39, %v2522_v38  ;;  %v2384_v42 = vld [vmem:[%s4333_s23 + $0x1] ss:$0 sm:$0xff] }
 0x300   : > { %3180 = vmatprep.subr.bf16.mxu0 %v3712_v0  ;;  %3192 = vmatprep.subr.bf16.mxu1 %v3712_v0 }
 0x303   : > { %3182 = vmatpush3.bf16.msra.mxu0 %v3181_v47  ;;  %3194 = vmatpush3.bf16.msra.mxu1 %v3193_v48 }
 0x304   : > { %3183 = vmatprep.subr.bf16.mxu0 %v3712_v0  ;;  %3195 = vmatprep.subr.bf16.mxu1 %v3712_v0 }
 0x307   : > { %3185 = vmatpush3.bf16.msra.mxu0 %v3184_v53  ;;  %3197 = vmatpush3.bf16.msra.mxu1 %v3196_v54 }
 0x308   : > { %3198 = vmatprep.subr.bf16.mxu0 %v3712_v0  ;;  %3210 = vmatprep.subr.bf16.mxu1 %v3712_v0 }
 0x30a   : > { %2936 = vmatmul.mubr.msk.f32.vlgmr.msra.gmra.mrb[12].mxu0 %vm509_vm2, %v4110_v5  ;;  %2955 = vmatmul.mubr.msk.f32.vlgmr.msra.gmra.mrb[12].mxu1 %vm509_vm2, %v4110_v5 }
 0x30b   : > { %3200 = vmatpush3.bf16.msra.mxu0 %v3199_v59  ;;  %3212 = vmatpush3.bf16.msra.mxu1 %v3211_v60 }
 0x30c   : > { %3201 = vmatprep.subr.bf16.mxu0 %v3712_v0  ;;  %3213 = vmatprep.subr.bf16.mxu1 %v3712_v0 }
 0x30d   : > { %2973 = vmatprep.mubr.msk.f32.mxu0 %vm3713_vm0, %v3714_v1  ;;  %2992 = vmatprep.mubr.msk.f32.mxu1 %vm3713_vm0, %v3714_v1 }
 0x30f   : > { %3203 = vmatpush3.bf16.msra.mxu0 %v3202_v3  ;;  %3215 = vmatpush3.bf16.msra.mxu1 %v3214_v4 }
 0x310   : > { %3204 = vmatprep.subr.bf16.mxu0 %v3712_v0  ;;  %3216 = vmatprep.subr.bf16.mxu1 %v3712_v0 }
 0x313   : > { %3206 = vmatpush3.bf16.msra.mxu0 %v3205_v10  ;;  %3218 = vmatpush3.bf16.msra.mxu1 %v3217_v11 }
 0x314   : > { %3207 = vmatprep.subr.bf16.mxu0 %v3712_v0  ;;  %3219 = vmatprep.subr.bf16.mxu1 %v3712_v0 }
 0x317   : > { %3209 = vmatpush3.bf16.msra.mxu0 %v3208_v16  ;;  %3221 = vmatpush3.bf16.msra.mxu1 %v3220_v17 }
 0x318   : > { %3222 = vmatprep.subr.bf16.mxu0 %v3712_v0  ;;  %3234 = vmatprep.subr.bf16.mxu1 %v3712_v0 }
 0x31a   : > { %2974 = vmatmul.mubr.msk.f32.vlgmr.msra.gmra.mrb[14].mxu0 %vm509_vm2, %v4110_v5  ;;  %2993 = vmatmul.mubr.msk.f32.vlgmr.msra.gmra.mrb[14].mxu1 %vm509_vm2, %v4110_v5 }
 0x31b   : > { %3224 = vmatpush3.bf16.msra.mxu0 %v3223_v22  ;;  %3236 = vmatpush3.bf16.msra.mxu1 %v3235_v23 }
 0x31c   : > { %3225 = vmatprep.subr.bf16.mxu0 %v3712_v0  ;;  %3237 = vmatprep.subr.bf16.mxu1 %v3712_v0 }
 0x31d   : > { %3011 = vmatprep.mubr.msk.f32.mxu0 %vm3713_vm0, %v3714_v1  ;;  %3030 = vmatprep.mubr.msk.f32.mxu1 %vm3713_vm0, %v3714_v1  ;;  %v2374_v1 = vld [vmem:[%s4333_s23] ss:$0 sm:$0xff] }
 0x31f   : > { %3227 = vmatpush3.bf16.msra.mxu0 %v3226_v28  ;;  %3239 = vmatpush3.bf16.msra.mxu1 %v3238_v29 }
 0x320   : > { %3228 = vmatprep.subr.bf16.mxu0 %v3712_v0  ;;  %3240 = vmatprep.subr.bf16.mxu1 %v3712_v0 }
 0x323   : > { %3230 = vmatpush3.bf16.msra.mxu0 %v3229_v34  ;;  %3242 = vmatpush3.bf16.msra.mxu1 %v3241_v35 }
 0x324   : > { %3231 = vmatprep.subr.bf16.mxu0 %v3712_v0  ;;  %3243 = vmatprep.subr.bf16.mxu1 %v3712_v0 }
 0x327   : > { %3233 = vmatpush3.bf16.msra.mxu0 %v3232_v40  ;;  %3245 = vmatpush3.bf16.msra.mxu1 %v3244_v41 }
 0x32a   : > { %3012 = vmatmul.mubr.msk.f32.vlgmr.msra.gmra.mrb[16].mxu0 %vm509_vm2, %v4110_v5  ;;  %3031 = vmatmul.mubr.msk.f32.vlgmr.msra.gmra.mrb[16].mxu1 %vm509_vm2, %v4110_v5 }
 0x38d   : > { %v666_v43 = vpop.f32.mrb[2].mxu0  ;;  %v769_v0 = vpop.f32.mrb[2].mxu1 }
 0x38e   : > { %v667_v44 = vadd.f32 %v2374_v1, %v666_v43  ;;  %v770_v45 = vadd.f32 %v2384_v42, %v769_v0  ;;  %v2747_v46 = vpop.f32.mrb[3].mxu0  ;;  %v2766_v47 = vpop.f32.mrb[3].mxu1  ;;  %v2434_v1 = vld [vmem:[%s4333_s23 + $0x6] ss:$0 sm:$0xff]  ;;  %v2444_v42 = vld [vmem:[%s4333_s23 + $0x7] ss:$0 sm:$0xff] }
 0x390   : > { %v670_v48 = vsub.f32 0.0, %v667_v44  ;;  %v773_v49 = vsub.f32 0.0, %v770_v45 }
 0x392   : > { %v671_v50 = vmul.f32 1.442695, %v670_v48  ;;  %v774_v5 = vmul.f32 1.442695, %v773_v49 }
 0x394   : > { %3359 = vpow2.f32 %v671_v50 }
 0x395   : > { %3361 = vpow2.f32 %v774_v5 }
 0x39d   : > { %v869_v53 = vpop.f32.mrb[4].mxu0  ;;  %v969_v54 = vpop.f32.mrb[4].mxu1 }
 0x39e   : > { %v3360_v55 = vpop.eup %3359  ;;  %v870_v56 = vadd.f32 %v2394_v51, %v869_v53  ;;  %v970_v57 = vadd.f32 %v2404_v52, %v969_v54  ;;  %v2785_v58 = vpop.f32.mrb[5].mxu0 }
 0x39f   : > { %v2804_v59 = vpop.f32.mrb[5].mxu1  ;;  %v3362_v60 = vpop.eup %3361  ;;  %v673_v61 = vadd.f32 1.0, %v3360_v55 }
 0x3a0   : > { %v776_v62 = vadd.f32 1.0, %v3362_v60  ;;  %v873_v63 = vsub.f32 0.0, %v870_v56  ;;  %v973_v2 = vsub.f32 0.0, %v970_v57 }
 0x3a1   : > { %3363 = vrcp.f32 %v673_v61 }
 0x3a2   : > { %3365 = vrcp.f32 %v776_v62  ;;  %v874_v3 = vmul.f32 1.442695, %v873_v63  ;;  %v974_v4 = vmul.f32 1.442695, %v973_v2 }
 0x3a4   : > { %3367 = vpow2.f32 %v874_v3 }
 0x3a5   : > { %3369 = vpow2.f32 %v974_v4 }
 0x3ab   : > { %v3364_v6 = vpop.eup %3363 }
 0x3ac   : > { %v3366_v9 = vpop.eup %3365  ;;  %v675_v10 = vmul.f32 1160.0, %v3364_v6 }
 0x3ad   : > { %v778_v11 = vmul.f32 1160.0, %v3366_v9  ;;  %v1069_v12 = vpop.f32.mrb[6].mxu0  ;;  %v1169_v13 = vpop.f32.mrb[6].mxu1 }
 0x3ae   : > { %v3368_v14 = vpop.eup %3367  ;;  %v676_v15 = vadd.f32 340.0, %v675_v10  ;;  %v1070_v16 = vadd.f32 %v2414_v7, %v1069_v12  ;;  %v1170_v17 = vadd.f32 %v2424_v8, %v1169_v13  ;;  %v2823_v18 = vpop.f32.mrb[7].mxu0 }
 0x3af   : > { %v2842_v19 = vpop.f32.mrb[7].mxu1  ;;  %v3370_v20 = vpop.eup %3369  ;;  %v779_v21 = vadd.f32 340.0, %v778_v11  ;;  %v876_v22 = vadd.f32 1.0, %v3368_v14 }
 0x3b0   : > { %v678_v23 = vsel %vm677_vm3, %v676_v15, 0.0  ;;  %v976_v24 = vadd.f32 1.0, %v3370_v20  ;;  %v1073_v25 = vsub.f32 0.0, %v1070_v16  ;;  %v1173_v26 = vsub.f32 0.0, %v1170_v17  ;;  %v2454_v16 = vld [vmem:[%s4333_s23 + $0x8] ss:$0 sm:$0xff] }
 0x3b1   : > { %v679_v27 = vrot.slane %v678_v23, 4  ;;  %v780_v28 = vsel %vm677_vm3, %v779_v21, 0.0  ;;  %3371 = vrcp.f32 %v876_v22  ;;  %v2464_v17 = vld [vmem:[%s4333_s23 + $0x9] ss:$0 sm:$0xff] }
 0x3b2   : > { %v781_v29 = vrot.slane %v780_v28, 4  ;;  %3373 = vrcp.f32 %v976_v24  ;;  %v1074_v30 = vmul.f32 1.442695, %v1073_v25  ;;  %v1174_v31 = vmul.f32 1.442695, %v1173_v26 }
 0x3b3   : > { %v680_v32 = vadd.f32 %v679_v27, %v678_v23 }
 0x3b4   : > { %v782_v33 = vadd.f32 %v781_v29, %v780_v28  ;;  %3375 = vpow2.f32 %v1074_v30 }
 0x3b5   : > { %v681_v34 = vrot.slane %v680_v32, 2  ;;  %3377 = vpow2.f32 %v1174_v31 }
 0x3b6   : > { %v783_v35 = vrot.slane %v782_v33, 2 }
 0x3b7   : > { %v682_v36 = vadd.f32 %v681_v34, %v680_v32 }
 0x3b8   : > { %v784_v37 = vadd.f32 %v783_v35, %v782_v33 }
 0x3b9   : > { %v683_v38 = vrot.slane %v682_v36, 1 }
 0x3ba   : > { %v785_v39 = vrot.slane %v784_v37, 1 }
 0x3bb   : > { %v3372_v40 = vpop.eup %3371  ;;  %v684_v41 = vadd.f32 %v683_v38, %v682_v36 }
 0x3bc   : > { %v3374_v43 = vpop.eup %3373  ;;  %v786_v0 = vadd.f32 %v785_v39, %v784_v37  ;;  %v878_v44 = vmul.f32 1160.0, %v3372_v40 }
 0x3bd   : > { %v686_v45 = vmul.f32 0.25, %v684_v41  ;;  %v978_v46 = vmul.f32 1160.0, %v3374_v43  ;;  %v1269_v47 = vpop.f32.mrb[8].mxu0  ;;  %v1369_v48 = vpop.f32.mrb[8].mxu1 }
 0x3be   : > { %v3376_v49 = vpop.eup %3375  ;;  %v787_v50 = vmul.f32 0.25, %v786_v0  ;;  %v879_v5 = vadd.f32 340.0, %v878_v44  ;;  %v1270_v51 = vadd.f32 %v2434_v1, %v1269_v47  ;;  %v1370_v52 = vadd.f32 %v2444_v42, %v1369_v48  ;;  %v2861_v53 = vpop.f32.mrb[9].mxu0 }
 0x3bf   : > { %v2880_v54 = vpop.f32.mrb[9].mxu1  ;;  %v3378_v55 = vpop.eup %3377  ;;  %688 = vst.msk [vmem:[%s4347_s29] sm:$0x1] %vm687_vm4, %v686_v45  ;;  %v979_v56 = vadd.f32 340.0, %v978_v46  ;;  %v1076_v57 = vadd.f32 1.0, %v3376_v49 }
 0x3c0   : > { %788 = vst.msk [vmem:[%s4347_s29 + $0x1] sm:$0x1] %vm687_vm4, %v787_v50  ;;  %v880_v58 = vsel %vm677_vm3, %v879_v5, 0.0  ;;  %v1176_v59 = vadd.f32 1.0, %v3378_v55  ;;  %v1273_v60 = vsub.f32 0.0, %v1270_v51  ;;  %v1373_v61 = vsub.f32 0.0, %v1370_v52 }
 0x3c1   : > { %v881_v62 = vrot.slane %v880_v58, 4  ;;  %v980_v63 = vsel %vm677_vm3, %v979_v56, 0.0  ;;  %3379 = vrcp.f32 %v1076_v57  ;;  %v2474_v51 = vld [vmem:[%s4333_s23 + $0xa] ss:$0 sm:$0xff]  ;;  %v2484_v52 = vld [vmem:[%s4333_s23 + $0xb] ss:$0 sm:$0xff] }
 0x3c2   : > { %v981_v2 = vrot.slane %v980_v63, 4  ;;  %3381 = vrcp.f32 %v1176_v59  ;;  %v1274_v3 = vmul.f32 1.442695, %v1273_v60  ;;  %v1374_v4 = vmul.f32 1.442695, %v1373_v61 }
 0x3c3   : > { %v882_v6 = vadd.f32 %v881_v62, %v880_v58 }
 0x3c4   : > { %v982_v7 = vadd.f32 %v981_v2, %v980_v63  ;;  %3383 = vpow2.f32 %v1274_v3 }
 0x3c5   : > { %v883_v8 = vrot.slane %v882_v6, 2  ;;  %3385 = vpow2.f32 %v1374_v4 }
 0x3c6   : > { %v983_v9 = vrot.slane %v982_v7, 2 }
 0x3c7   : > { %v884_v10 = vadd.f32 %v883_v8, %v882_v6 }
 0x3c8   : > { %v984_v11 = vadd.f32 %v983_v9, %v982_v7 }
 0x3c9   : > { %v885_v12 = vrot.slane %v884_v10, 1 }
 0x3ca   : > { %v985_v13 = vrot.slane %v984_v11, 1 }
 0x3cb   : > { %v3380_v14 = vpop.eup %3379  ;;  %v886_v15 = vadd.f32 %v885_v12, %v884_v10 }
 0x3cc   : > { %v3382_v18 = vpop.eup %3381  ;;  %v986_v19 = vadd.f32 %v985_v13, %v984_v11  ;;  %v1078_v20 = vmul.f32 1160.0, %v3380_v14 }
 0x3cd   : > { %v887_v21 = vmul.f32 0.25, %v886_v15  ;;  %v1178_v22 = vmul.f32 1160.0, %v3382_v18  ;;  %v1469_v23 = vpop.f32.mrb[10].mxu0  ;;  %v1569_v24 = vpop.f32.mrb[10].mxu1 }
 0x3ce   : > { %v3384_v25 = vpop.eup %3383  ;;  %v987_v26 = vmul.f32 0.25, %v986_v19  ;;  %v1079_v27 = vadd.f32 340.0, %v1078_v20  ;;  %v1470_v28 = vadd.f32 %v2454_v16, %v1469_v23  ;;  %v1570_v29 = vadd.f32 %v2464_v17, %v1569_v24  ;;  %v2899_v30 = vpop.f32.mrb[11].mxu0 }
 0x3cf   : > { %v2918_v31 = vpop.f32.mrb[11].mxu1  ;;  %v3386_v32 = vpop.eup %3385  ;;  %888 = vst.msk [vmem:[%s4347_s29 + $0x2] sm:$0x1] %vm687_vm4, %v887_v21  ;;  %v1179_v33 = vadd.f32 340.0, %v1178_v22  ;;  %v1276_v34 = vadd.f32 1.0, %v3384_v25 }
 0x3d0   : > { %988 = vst.msk [vmem:[%s4347_s29 + $0x3] sm:$0x1] %vm687_vm4, %v987_v26  ;;  %v1080_v35 = vsel %vm677_vm3, %v1079_v27, 0.0  ;;  %v1376_v36 = vadd.f32 1.0, %v3386_v32  ;;  %v1473_v37 = vsub.f32 0.0, %v1470_v28  ;;  %v1573_v38 = vsub.f32 0.0, %v1570_v29 }
 0x3d1   : > { %v1081_v39 = vrot.slane %v1080_v35, 4  ;;  %v1180_v40 = vsel %vm677_vm3, %v1179_v33, 0.0  ;;  %3387 = vrcp.f32 %v1276_v34  ;;  %v2494_v28 = vld [vmem:[%s4333_s23 + $0xc] ss:$0 sm:$0xff]  ;;  %v2504_v29 = vld [vmem:[%s4333_s23 + $0xd] ss:$0 sm:$0xff] }
 0x3d2   : > { %v1181_v41 = vrot.slane %v1180_v40, 4  ;;  %3389 = vrcp.f32 %v1376_v36  ;;  %v1474_v1 = vmul.f32 1.442695, %v1473_v37  ;;  %v1574_v42 = vmul.f32 1.442695, %v1573_v38 }
 0x3d3   : > { %v1082_v43 = vadd.f32 %v1081_v39, %v1080_v35 }
 0x3d4   : > { %v1182_v0 = vadd.f32 %v1181_v41, %v1180_v40  ;;  %3391 = vpow2.f32 %v1474_v1 }
 0x3d5   : > { %v1083_v44 = vrot.slane %v1082_v43, 2  ;;  %3393 = vpow2.f32 %v1574_v42 }
 0x3d6   : > { %v1183_v45 = vrot.slane %v1182_v0, 2 }
 0x3d7   : > { %v1084_v46 = vadd.f32 %v1083_v44, %v1082_v43 }
 0x3d8   : > { %v1184_v47 = vadd.f32 %v1183_v45, %v1182_v0 }
 0x3d9   : > { %v1085_v48 = vrot.slane %v1084_v46, 1 }
 0x3da   : > { %v1185_v49 = vrot.slane %v1184_v47, 1 }
 0x3db   : > { %v3388_v50 = vpop.eup %3387  ;;  %v1086_v5 = vadd.f32 %v1085_v48, %v1084_v46 }
 0x3dc   : > { %v3390_v53 = vpop.eup %3389  ;;  %v1186_v54 = vadd.f32 %v1185_v49, %v1184_v47  ;;  %v1278_v55 = vmul.f32 1160.0, %v3388_v50 }
 0x3dd   : > { %v1087_v56 = vmul.f32 0.25, %v1086_v5  ;;  %v1378_v57 = vmul.f32 1160.0, %v3390_v53  ;;  %v1669_v58 = vpop.f32.mrb[12].mxu0  ;;  %v1769_v59 = vpop.f32.mrb[12].mxu1 }
 0x3de   : > { %v3392_v60 = vpop.eup %3391  ;;  %v1187_v61 = vmul.f32 0.25, %v1186_v54  ;;  %v1279_v62 = vadd.f32 340.0, %v1278_v55  ;;  %v1670_v63 = vadd.f32 %v2474_v51, %v1669_v58  ;;  %v1770_v2 = vadd.f32 %v2484_v52, %v1769_v59  ;;  %v2937_v3 = vpop.f32.mrb[13].mxu0 }
 0x3df   : > { %v2956_v4 = vpop.f32.mrb[13].mxu1  ;;  %v3394_v6 = vpop.eup %3393  ;;  %1088 = vst.msk [vmem:[%s4347_s29 + $0x4] sm:$0x1] %vm687_vm4, %v1087_v56  ;;  %v1379_v7 = vadd.f32 340.0, %v1378_v57  ;;  %v1476_v8 = vadd.f32 1.0, %v3392_v60 }
 0x3e0   : > { %1188 = vst.msk [vmem:[%s4347_s29 + $0x5] sm:$0x1] %vm687_vm4, %v1187_v61  ;;  %v1280_v9 = vsel %vm677_vm3, %v1279_v62, 0.0  ;;  %v1576_v10 = vadd.f32 1.0, %v3394_v6  ;;  %v1673_v11 = vsub.f32 0.0, %v1670_v63  ;;  %v1773_v12 = vsub.f32 0.0, %v1770_v2 }
 0x3e1   : > { %v1281_v13 = vrot.slane %v1280_v9, 4  ;;  %v1380_v14 = vsel %vm677_vm3, %v1379_v7, 0.0  ;;  %3395 = vrcp.f32 %v1476_v8  ;;  %v2514_v63 = vld [vmem:[%s4333_s23 + $0xe] ss:$0 sm:$0xff]  ;;  %v2524_v2 = vld [vmem:[%s4333_s23 + $0xf] ss:$0 sm:$0xff] }
 0x3e2   : > { %v1381_v15 = vrot.slane %v1380_v14, 4  ;;  %3397 = vrcp.f32 %v1576_v10  ;;  %v1674_v16 = vmul.f32 1.442695, %v1673_v11  ;;  %v1774_v17 = vmul.f32 1.442695, %v1773_v12 }
 0x3e3   : > { %v1282_v18 = vadd.f32 %v1281_v13, %v1280_v9 }
 0x3e4   : > { %v1382_v19 = vadd.f32 %v1381_v15, %v1380_v14  ;;  %3399 = vpow2.f32 %v1674_v16 }
 0x3e5   : > { %v1283_v20 = vrot.slane %v1282_v18, 2  ;;  %3401 = vpow2.f32 %v1774_v17 }
 0x3e6   : > { %v1383_v21 = vrot.slane %v1382_v19, 2 }
 0x3e7   : > { %v1284_v22 = vadd.f32 %v1283_v20, %v1282_v18 }
 0x3e8   : > { %v1384_v23 = vadd.f32 %v1383_v21, %v1382_v19 }
 0x3e9   : > { %v1285_v24 = vrot.slane %v1284_v22, 1 }
 0x3ea   : > { %v1385_v25 = vrot.slane %v1384_v23, 1 }
 0x3eb   : > { %v3396_v26 = vpop.eup %3395  ;;  %v1286_v27 = vadd.f32 %v1285_v24, %v1284_v22 }
 0x3ec   : > { %v3398_v30 = vpop.eup %3397  ;;  %v1386_v31 = vadd.f32 %v1385_v25, %v1384_v23  ;;  %v1478_v32 = vmul.f32 1160.0, %v3396_v26 }
 0x3ed   : > { %v1287_v33 = vmul.f32 0.25, %v1286_v27  ;;  %v1578_v34 = vmul.f32 1160.0, %v3398_v30  ;;  %v1869_v35 = vpop.f32.mrb[14].mxu0  ;;  %v1969_v36 = vpop.f32.mrb[14].mxu1 }
 0x3ee   : > { %v3400_v37 = vpop.eup %3399  ;;  %v1387_v38 = vmul.f32 0.25, %v1386_v31  ;;  %v1479_v39 = vadd.f32 340.0, %v1478_v32  ;;  %v1870_v40 = vadd.f32 %v2494_v28, %v1869_v35  ;;  %v1970_v41 = vadd.f32 %v2504_v29, %v1969_v36  ;;  %v2975_v1 = vpop.f32.mrb[15].mxu0 }
 0x3ef   : > { %v2994_v42 = vpop.f32.mrb[15].mxu1  ;;  %v3402_v43 = vpop.eup %3401  ;;  %1288 = vst.msk [vmem:[%s4347_s29 + $0x6] sm:$0x1] %vm687_vm4, %v1287_v33  ;;  %v1579_v0 = vadd.f32 340.0, %v1578_v34  ;;  %v1676_v44 = vadd.f32 1.0, %v3400_v37 }
 0x3f0   : > { %1388 = vst.msk [vmem:[%s4347_s29 + $0x7] sm:$0x1] %vm687_vm4, %v1387_v38  ;;  %v1480_v45 = vsel %vm677_vm3, %v1479_v39, 0.0  ;;  %v1776_v46 = vadd.f32 1.0, %v3402_v43  ;;  %v1873_v47 = vsub.f32 0.0, %v1870_v40  ;;  %v1973_v48 = vsub.f32 0.0, %v1970_v41 }
 0x3f1   : > { %v1481_v49 = vrot.slane %v1480_v45, 4  ;;  %v1580_v50 = vsel %vm677_vm3, %v1579_v0, 0.0  ;;  %3403 = vrcp.f32 %v1676_v44 }
 0x3f2   : > { %v1581_v5 = vrot.slane %v1580_v50, 4  ;;  %3405 = vrcp.f32 %v1776_v46  ;;  %v1874_v51 = vmul.f32 1.442695, %v1873_v47  ;;  %v1974_v52 = vmul.f32 1.442695, %v1973_v48 }
 0x3f3   : > { %v1482_v53 = vadd.f32 %v1481_v49, %v1480_v45 }
 0x3f4   : > { %v1582_v54 = vadd.f32 %v1581_v5, %v1580_v50  ;;  %3407 = vpow2.f32 %v1874_v51 }
 0x3f5   : > { %v1483_v55 = vrot.slane %v1482_v53, 2  ;;  %3409 = vpow2.f32 %v1974_v52 }
 0x3f6   : > { %v1583_v56 = vrot.slane %v1582_v54, 2 }
 0x3f7   : > { %v1484_v57 = vadd.f32 %v1483_v55, %v1482_v53 }
 0x3f8   : > { %v1584_v58 = vadd.f32 %v1583_v56, %v1582_v54 }
 0x3f9   : > { %v1485_v59 = vrot.slane %v1484_v57, 1 }
 0x3fa   : > { %v1585_v60 = vrot.slane %v1584_v58, 1 }
 0x3fb   : > { %v3404_v61 = vpop.eup %3403  ;;  %v1486_v62 = vadd.f32 %v1485_v59, %v1484_v57 }
 0x3fc   : > { %v3406_v3 = vpop.eup %3405  ;;  %v1586_v4 = vadd.f32 %v1585_v60, %v1584_v58  ;;  %v1678_v6 = vmul.f32 1160.0, %v3404_v61 }
 0x3fd   : > { %v1487_v7 = vmul.f32 0.25, %v1486_v62  ;;  %v1778_v8 = vmul.f32 1160.0, %v3406_v3  ;;  %v2069_v9 = vpop.f32.mrb[16].mxu0  ;;  %v2169_v10 = vpop.f32.mrb[16].mxu1 }
 0x3fe   : > { %v3408_v11 = vpop.eup %3407  ;;  %v1587_v12 = vmul.f32 0.25, %v1586_v4  ;;  %v1679_v13 = vadd.f32 340.0, %v1678_v6  ;;  %v2070_v14 = vadd.f32 %v2514_v63, %v2069_v9  ;;  %v2170_v15 = vadd.f32 %v2524_v2, %v2169_v10  ;;  %v3013_v16 = vpop.f32.mrb[17].mxu0 }
 0x3ff   : > { %v3032_v17 = vpop.f32.mrb[17].mxu1  ;;  %v3410_v18 = vpop.eup %3409  ;;  %1488 = vst.msk [vmem:[%s4347_s29 + $0x8] sm:$0x1] %vm687_vm4, %v1487_v7  ;;  %v1779_v19 = vadd.f32 340.0, %v1778_v8  ;;  %v1876_v20 = vadd.f32 1.0, %v3408_v11 }
 0x400   : > { %1588 = vst.msk [vmem:[%s4347_s29 + $0x9] sm:$0x1] %vm687_vm4, %v1587_v12  ;;  %v1680_v21 = vsel %vm677_vm3, %v1679_v13, 0.0  ;;  %v1976_v22 = vadd.f32 1.0, %v3410_v18  ;;  %v2073_v23 = vsub.f32 0.0, %v2070_v14  ;;  %v2173_v24 = vsub.f32 0.0, %v2170_v15 }
 0x401   : > { %v1681_v25 = vrot.slane %v1680_v21, 4  ;;  %v1780_v26 = vsel %vm677_vm3, %v1779_v19, 0.0  ;;  %3411 = vrcp.f32 %v1876_v20 }
 0x402   : > { %v1781_v27 = vrot.slane %v1780_v26, 4  ;;  %3413 = vrcp.f32 %v1976_v22  ;;  %v2074_v28 = vmul.f32 1.442695, %v2073_v23  ;;  %v2174_v29 = vmul.f32 1.442695, %v2173_v24 }
 0x403   : > { %v1682_v30 = vadd.f32 %v1681_v25, %v1680_v21 }
 0x404   : > { %v1782_v31 = vadd.f32 %v1781_v27, %v1780_v26  ;;  %3415 = vpow2.f32 %v2074_v28 }
 0x405   : > { %v1683_v32 = vrot.slane %v1682_v30, 2  ;;  %3417 = vpow2.f32 %v2174_v29 }
 0x406   : > { %v1783_v33 = vrot.slane %v1782_v31, 2 }
 0x407   : > { %v1684_v34 = vadd.f32 %v1683_v32, %v1682_v30 }
 0x408   : > { %v1784_v35 = vadd.f32 %v1783_v33, %v1782_v31 }
 0x409   : > { %v1685_v36 = vrot.slane %v1684_v34, 1 }
 0x40a   : > { %v1785_v37 = vrot.slane %v1784_v35, 1 }
 0x40b   : > { %v3412_v38 = vpop.eup %3411  ;;  %v1686_v39 = vadd.f32 %v1685_v36, %v1684_v34 }
 0x40c   : > { %v3414_v40 = vpop.eup %3413  ;;  %v1786_v41 = vadd.f32 %v1785_v37, %v1784_v35  ;;  %v1878_v1 = vmul.f32 1160.0, %v3412_v38 }
 0x40d   : > { %v1687_v42 = vmul.f32 0.25, %v1686_v39  ;;  %v1978_v43 = vmul.f32 1160.0, %v3414_v40 }
 0x40e   : > { %v3416_v0 = vpop.eup %3415  ;;  %v1787_v44 = vmul.f32 0.25, %v1786_v41  ;;  %v1879_v45 = vadd.f32 340.0, %v1878_v1 }
 0x40f   : > { %v3418_v46 = vpop.eup %3417  ;;  %1688 = vst.msk [vmem:[%s4347_s29 + $0xa] sm:$0x1] %vm687_vm4, %v1687_v42  ;;  %v1979_v47 = vadd.f32 340.0, %v1978_v43  ;;  %v2076_v48 = vadd.f32 1.0, %v3416_v0 }
 0x410   : > { %1788 = vst.msk [vmem:[%s4347_s29 + $0xb] sm:$0x1] %vm687_vm4, %v1787_v44  ;;  %v1880_v49 = vsel %vm677_vm3, %v1879_v45, 0.0  ;;  %v2176_v50 = vadd.f32 1.0, %v3418_v46 }
 0x411   : > { %v1881_v5 = vrot.slane %v1880_v49, 4  ;;  %v1980_v51 = vsel %vm677_vm3, %v1979_v47, 0.0  ;;  %3419 = vrcp.f32 %v2076_v48 }
 0x412   : > { %v1981_v52 = vrot.slane %v1980_v51, 4  ;;  %3421 = vrcp.f32 %v2176_v50 }
 0x413   : > { %v1882_v53 = vadd.f32 %v1881_v5, %v1880_v49 }
 0x414   : > { %v1982_v54 = vadd.f32 %v1981_v52, %v1980_v51 }
 0x415   : > { %v1883_v55 = vrot.slane %v1882_v53, 2 }
 0x416   : > { %v1983_v56 = vrot.slane %v1982_v54, 2 }
 0x417   : > { %v1884_v57 = vadd.f32 %v1883_v55, %v1882_v53 }
 0x418   : > { %v1984_v58 = vadd.f32 %v1983_v56, %v1982_v54 }
 0x419   : > { %v1885_v59 = vrot.slane %v1884_v57, 1 }
 0x41a   : > { %v1985_v60 = vrot.slane %v1984_v58, 1 }
 0x41b   : > { %v3420_v61 = vpop.eup %3419  ;;  %v1886_v62 = vadd.f32 %v1885_v59, %v1884_v57 }
 0x41c   : > { %v3422_v63 = vpop.eup %3421  ;;  %v1986_v2 = vadd.f32 %v1985_v60, %v1984_v58  ;;  %v2078_v3 = vmul.f32 1160.0, %v3420_v61 }
 0x41d   : > { %v1887_v4 = vmul.f32 0.25, %v1886_v62  ;;  %v2178_v6 = vmul.f32 1160.0, %v3422_v63 }
 0x41e   : > { %v1987_v7 = vmul.f32 0.25, %v1986_v2  ;;  %v2079_v8 = vadd.f32 340.0, %v2078_v3 }
 0x41f   : > { %1888 = vst.msk [vmem:[%s4347_s29 + $0xc] sm:$0x1] %vm687_vm4, %v1887_v4  ;;  %v2179_v9 = vadd.f32 340.0, %v2178_v6 }
 0x420   : > { %1988 = vst.msk [vmem:[%s4347_s29 + $0xd] sm:$0x1] %vm687_vm4, %v1987_v7  ;;  %v2080_v10 = vsel %vm677_vm3, %v2079_v8, 0.0 }
 0x421   : > { %v2081_v11 = vrot.slane %v2080_v10, 4  ;;  %v2180_v12 = vsel %vm677_vm3, %v2179_v9, 0.0 }
 0x422   : > { %v2181_v13 = vrot.slane %v2180_v12, 4 }
 0x423   : > { %v2082_v14 = vadd.f32 %v2081_v11, %v2080_v10 }
 0x424   : > { %v2182_v15 = vadd.f32 %v2181_v13, %v2180_v12 }
 0x425   : > { %v2083_v16 = vrot.slane %v2082_v14, 2 }
 0x426   : > { %v2183_v17 = vrot.slane %v2182_v15, 2 }
 0x427   : > { %v2084_v18 = vadd.f32 %v2083_v16, %v2082_v14 }
 0x428   : > { %v2184_v19 = vadd.f32 %v2183_v17, %v2182_v15 }
 0x429   : > { %v2085_v20 = vrot.slane %v2084_v18, 1 }
 0x42a   : > { %v2185_v21 = vrot.slane %v2184_v19, 1 }
 0x42b   : > { %v2086_v22 = vadd.f32 %v2085_v20, %v2084_v18 }
 0x42c   : > { %v2186_v23 = vadd.f32 %v2185_v21, %v2184_v19 }
 0x42d   : > { %v2087_v24 = vmul.f32 0.25, %v2086_v22 }
 0x42e   : > { %v2187_v25 = vmul.f32 0.25, %v2186_v23 }
 0x42f   : > { %2088 = vst.msk [vmem:[%s4347_s29 + $0xe] sm:$0x1] %vm687_vm4, %v2087_v24 }
 0x430   : > { %2188 = vst.msk [vmem:[%s4347_s29 + $0xf] sm:$0x1] %vm687_vm4, %v2187_v25 }
 0x431   : > { %3636 = shalt.err (!%p3633_p8)
}
 0x432   : > { %s3637_s15 = scalar_lea.hbm %s4404_s28, 256  ;;  %s3641_s3 = scalar_lea.hbm %s4460_s7, 1024 }
 0x433   : > { %p3638_p13 = scmp.ne.s32.totalorder %s4404_s28, %s3637_s15  ;;  %p3642_p2 = scmp.lt.u32.totalorder %s4404_s28, %s4460_s7 }
 0x434   : > { %p3643_p12 = scmp.lt.u32.totalorder %s3641_s3, %s3637_s15  ;;  %p3645_p1 = scmp.lt.u32.totalorder %s3637_s15, %s4404_s28 }
 0x435   : > { %p3639_p3 = pnand %p3638_p13, %p4514_p7 }
 0x436   : > { %p3644_p9 = por %p3643_p12, %p3642_p2 }
 0x437   : > { %p3640_p6 = pneg %p3639_p3 }
 0x438   : > { %p3646_p5 = por %p3645_p1, %p3644_p9 }
 0x43a   : > { %p3647_p4 = pnand %p3646_p5, %p3640_p6 }
 0x43c   : > { %3650 = shalt.err (!%p3647_p4)
}
 0x43d   : > { %s3716_s1 = smov 128   ;;  %s3717_s9 = smov 8  }
 0x43e   : > { %3270 = dma.vmem_to_hbm [thread:$0]  (%p4514_p7), %s4406_s5, 256, %s4404_s28, %s2190_s30, %s3716_s1, %s3716_s1, %s3717_s9  }
 0x43f PF: > { %s4515_s20 = sld [smem:[#allocation20_spill]]  ;;  %s4516_s19 = sld [smem:[#allocation24_spill]] }
 0x440   : > { %p3310_p0 = scmp.ge.s32.totalorder %s3701_s27, 2 }
 0x445   : > { %s2218_s10 = sand.u32 1, %s4515_s20   ;;  %p4517_p11 = scmp.ne.s32.totalorder %s4516_s19, 0 }
 0x446   : > { %s2219_s23 = scalar_lea.sflag [#allocation4], %s2218_s10 }
 0x447   : > { %p3296_p10 = pnand %p3310_p0, %p4517_p11 }
 0x449   : > { %3684 = dma.done.wait (!%p3296_p10), %s2219_s23, 256  }
 0x44a   : > { %3686 = vsyncadd (!%p3296_p10), %s2219_s23, 4294967040  ;;  %s4518_s27 = sld [smem:[#allocation22_spill]]  ;;  %s4519_s29 = sld [smem:[#allocation21_spill]] }
 0x44b   : > { %s4520_s26 = sld [smem:[#allocation23_spill]]  ;;  %s4521_s24 = smov %s3693_s25 }
 0x450   : > { %p23_p8 = scmp.ge.s32.totalorder %s4518_s27, 6   ;;  %s4522_s25 = smov %s4519_s29 }
 0x452   :  { %25 = sbr.rel (!%p23_p8) target bundleno = 13 (0xd), region = 140 }
 0x459   :  { %2224 = vsyncpa [#allocation3], 1 }
 0x45a   :  { %2226 = vsyncpa [#allocation3 + $0x1], 1 }
 0x45b   :  { %2227 = vsyncpa [#allocation6], 1 }
 0x45c   :  { %2228 = vsyncpa [#allocation9], 1 }
 0x45d   :  { %2229 = vsyncpa [#allocation12], 1 }
 0x45e   :  { %2231 = vsyncpa [#allocation12 + $0x1], 1 }
 0x45f   :  { %2232 = vsyncpa [#allocation4], 1 }
 0x460   :  { %2234 = vsyncpa [#allocation4 + $0x1], 1 }

</bundles_post_ra>
